<compile_context>
chip_gen: v5e
topology: v5e:2x2
jax: 0.10.0
libtpu: 0.0.40
codegen_flags: <defaults>
</compile_context>

<pallas_src>
import jax
import jax.numpy as jnp
from jax.experimental import pallas as pl


# ----------------------------- model dims -----------------------------------
BATCH = 2
SEQ = 8
INPUT_SIZE = 12
EMBED = 16            # self.embeding_size
HIDDEN = 32           # hidden_dim
N_LAYERS = 2
OUTPUT_SIZE = 2       # binary-gesture head

H = HIDDEN
G = 8 * H             # fused gate width: [i0 i1 f0 f1 g0 g1 o0 o1], 32 lanes each

# ------------------- packed weight-slab row offsets (8-aligned) --------------
R_W1 = 0      # (12, 32)
R_B1 = 16     # (1, 32)
R_W2 = 24     # (32, 16)
R_B2 = 56     # (1, 16)
R_WIH0 = 64   # (16, 256)  layer-0 input projection in fused gate space (g cols x2)
R_BIAS = 80   # (1, 256)   bias0 (layer-0 cols) + bias1 (layer-1 cols), g cols x2
R_REC = 88    # (64, 256)  fused recurrent RHS: rows 0:32 -> whh0|wih1, rows 32:64 -> whh1
R_WF = 152    # (32, 128)  head weight, zero-padded to 128 lanes
R_BF = 184    # (1, 128)
WS_ROWS = 192
WS_COLS = 256


def _gate_cols(layer, gate):
    """Fused gate-column block for (layer, gate); gate order i,f,g,o."""
    s = (2 * gate + layer) * H
    return s, s + H


# ----------------------------- fused Pallas kernel ---------------------------
def rtgr_fused_kernel(x_ref, ws_ref, hc_ref, out_ref, state_ref):
    B, S = BATCH, SEQ

    # ---- weights: static sub-views of one packed slab (single input DMA) ----
    w1 = ws_ref[R_W1:R_W1 + INPUT_SIZE, 0:32]
    b1 = ws_ref[R_B1:R_B1 + 1, 0:32]
    w2 = ws_ref[R_W2:R_W2 + 32, 0:EMBED]
    b2 = ws_ref[R_B2:R_B2 + 1, 0:EMBED]
    wih0 = ws_ref[R_WIH0:R_WIH0 + EMBED, :]        # (E, 8H) interleaved gate cols
    bias = ws_ref[R_BIAS:R_BIAS + 1, :]            # (1, 8H)
    wrec = ws_ref[R_REC:R_REC + 2 * H, :]          # (2H, 8H) fused recurrent RHS
    wf = ws_ref[R_WF:R_WF + H, 0:4 * H]            # (H, 128) zero-padded head
    bf = ws_ref[R_BF:R_BF + 1, 0:4 * H]

    # ---- fc1 + fc2 (+ReLU) over all B*S rows at once -------------------------
    x = x_ref[...]                                                 # (B*S, I)
    t1 = jnp.maximum(jnp.dot(x, w1, preferred_element_type=jnp.float32) + b1, 0.0)
    emb = jnp.maximum(jnp.dot(t1, w2, preferred_element_type=jnp.float32) + b2, 0.0)

    # ---- hoisted layer-0 input projection, directly in the fused gate space --
    # (g-gate columns pre-scaled x2 at pack time; layer-1 columns of wih0 are
    #  zero, so those lanes carry bias1 only — exactly the per-step additive
    #  term layer 1 needs.)
    xp = (jnp.dot(emb, wih0, preferred_element_type=jnp.float32) + bias
          ).reshape(B, S, G)
    # Static, loop-invariant extracts — not on the serial recurrence chain.
    xp_steps = [xp[:, t, :] for t in range(S)]

    # ---- fused 2-layer LSTM state: lanes [0:H]=layer0, [H:2H]=layer1 ---------
    hc = hc_ref[...]                               # (B, 4H) = [h_l0|h_l1|c_l0|c_l1]
    h_cat = hc[:, 0:2 * H]
    c_cat = hc[:, 2 * H:4 * H]

    lane = jax.lax.broadcasted_iota(jnp.int32, (B, 2 * H), 1)
    is_l0 = lane < H

    def fused_step(h_c, c_c, pre):
        # One MXU push per wave covers whh0 (layer 0), wih1 and whh1 (layer 1).
        gates = jnp.dot(h_c, wrec, preferred_element_type=jnp.float32) + pre  # (B, 8H)
        sg = jax.nn.sigmoid(gates)                 # single EUP pass over all gates
        i_g = sg[:, 0:2 * H]
        f_g = sg[:, 2 * H:4 * H]
        g_g = 2.0 * sg[:, 4 * H:6 * H] - 1.0       # tanh(x) = 2*sigmoid(2x) - 1
        o_g = sg[:, 6 * H:8 * H]
        c_n = f_g * c_c + i_g * g_g
        h_n = o_g * jnp.tanh(c_n)                  # only remaining tanh, 2H lanes
        return h_n, c_n

    # layer-1 outputs stay in registers; placed via iota+select (no VMEM scratch)
    seq1 = jnp.zeros((B, S, H), jnp.float32)
    t_idx = jax.lax.broadcasted_iota(jnp.int32, (B, S, H), 1)

    def put(seq, t, h1):
        return jnp.where(t_idx == t,
                         jnp.broadcast_to(h1[:, None, :], (B, S, H)), seq)

    # wave 0: layer-0 step 0 only (layer-1 lanes keep their initial state)
    h_n, c_n = fused_step(h_cat, c_cat, xp_steps[0])
    h_cat = jnp.where(is_l0, h_n, h_cat)
    c_cat = jnp.where(is_l0, c_n, c_cat)

    # waves 1..S-1: layer-0 step w and layer-1 step w-1 advance together
    for w in range(1, S):                          # static, fully unrolled
        h_cat, c_cat = fused_step(h_cat, c_cat, xp_steps[w])
        seq1 = put(seq1, w - 1, h_cat[:, H:2 * H])

    # wave S: layer-1 step S-1 only (layer-0 lanes keep their final state)
    h_n, c_n = fused_step(h_cat, c_cat, xp_steps[0])   # layer-0 lanes discarded
    h_cat = jnp.where(is_l0, h_cat, h_n)
    c_cat = jnp.where(is_l0, c_cat, c_n)
    seq1 = put(seq1, S - 1, h_cat[:, H:2 * H])

    # ---- final head: lane-dense (wf zero-padded to 128 cols), one full store --
    out = jnp.dot(seq1.reshape(B * S, H), wf,
                  preferred_element_type=jnp.float32) + bf          # (B*S, 128)
    out_ref[...] = out.astype(out_ref.dtype)

    # final states, written once into a single packed output
    state_ref[0] = h_cat[:, 0:H]
    state_ref[1] = h_cat[:, H:2 * H]
    state_ref[2] = c_cat[:, 0:H]
    state_ref[3] = c_cat[:, H:2 * H]


# ----------------------------- wrapper ---------------------------------------
@jax.jit
def rtgr_forward(ws, x, hidden):
    """ws: packed (192,256) weight slab (see pack_params); x: (B, S, input_size);
    hidden = (h0, c0), each (n_layers, B, H).
    Returns (out (B*S, output_size), (h_n, c_n))."""
    B, S, I = x.shape
    h0, c0 = hidden
    x_flat = x.reshape(B * S, I)                   # free contiguous flatten
    # pack the recurrent state into a single (B, 4H) input (one DMA)
    hc = jnp.concatenate([h0[0], h0[1], c0[0], c0[1]], axis=-1)

    out_pad, state = pl.pallas_call(
        rtgr_fused_kernel,
        out_shape=(
            jax.ShapeDtypeStruct((B * S, 4 * HIDDEN), jnp.float32),   # lane-dense
            jax.ShapeDtypeStruct((2 * N_LAYERS, B, HIDDEN), jnp.float32),
        ),
    )(x_flat, ws, hc)

    out = out_pad[:, :OUTPUT_SIZE]
    h_n = state[0:N_LAYERS]
    c_n = state[N_LAYERS:2 * N_LAYERS]
    return out, (h_n, c_n)


# ----------------------------- host-side weight packing (runs once) ----------
def pack_params(p):
    """Pack all weights into one (192, 256) f32 slab in the layouts the kernel
    consumes.  Runs once at setup; not part of the per-call path."""
    ws = jnp.zeros((WS_ROWS, WS_COLS), jnp.float32)
    ws = ws.at[R_W1:R_W1 + INPUT_SIZE, 0:32].set(p["w1"])
    ws = ws.at[R_B1, 0:32].set(p["b1"][0])
    ws = ws.at[R_W2:R_W2 + 32, 0:EMBED].set(p["w2"])
    ws = ws.at[R_B2, 0:EMBED].set(p["b2"][0])

    gscale = [1.0, 1.0, 2.0, 1.0]   # pre-scale g gate by 2 -> tanh via sigmoid
    for g in range(4):
        l0a, l0b = _gate_cols(0, g)
        l1a, l1b = _gate_cols(1, g)
        src = slice(g * H, (g + 1) * H)
        # layer-0 input projection + biases (layer-1 cols of wih0 stay zero)
        ws = ws.at[R_WIH0:R_WIH0 + EMBED, l0a:l0b].set(gscale[g] * p["wih"][0][:, src])
        ws = ws.at[R_BIAS, l0a:l0b].set(gscale[g] * p["bias"][0][0, src])
        ws = ws.at[R_BIAS, l1a:l1b].set(gscale[g] * p["bias"][1][0, src])
        # fused recurrent RHS
        ws = ws.at[R_REC:R_REC + H, l0a:l0b].set(gscale[g] * p["whh"][0][:, src])
        ws = ws.at[R_REC:R_REC + H, l1a:l1b].set(gscale[g] * p["wih"][1][:, src])
        ws = ws.at[R_REC + H:R_REC + 2 * H, l1a:l1b].set(gscale[g] * p["whh"][1][:, src])

    ws = ws.at[R_WF:R_WF + H, 0:OUTPUT_SIZE].set(p["wf"])
    ws = ws.at[R_BF, 0:OUTPUT_SIZE].set(p["bf"][0])
    return ws


# ----------------------------- pure-JAX reference ----------------------------
def ref_forward(params, x, hidden):
    B, S, I = x.shape
    h0_all, c0_all = hidden
    h = jnp.maximum(x.reshape(B * S, I) @ params["w1"] + params["b1"], 0.0)
    seq = jnp.maximum(h @ params["w2"] + params["b2"], 0.0).reshape(B, S, EMBED)
    hns, cns = [], []
    for l in range(N_LAYERS):
        wih, whh, b = params["wih"][l], params["whh"][l], params["bias"][l]
        hcur, ccur = h0_all[l], c0_all[l]
        outs = []
        for t in range(S):
            g = seq[:, t, :] @ wih + hcur @ whh + b
            i = jax.nn.sigmoid(g[:, :HIDDEN])
            f = jax.nn.sigmoid(g[:, HIDDEN:2 * HIDDEN])
            gg = jnp.tanh(g[:, 2 * HIDDEN:3 * HIDDEN])
            o = jax.nn.sigmoid(g[:, 3 * HIDDEN:])
            ccur = f * ccur + i * gg
            hcur = o * jnp.tanh(ccur)
            outs.append(hcur)
        seq = jnp.stack(outs, axis=1)
        hns.append(hcur)
        cns.append(ccur)
    out = seq.reshape(B * S, HIDDEN) @ params["wf"] + params["bf"]
    return out, (jnp.stack(hns), jnp.stack(cns))


# ----------------------------- parameter init --------------------------------
def init_params(key):
    ks = jax.random.split(key, 4 + 3 * N_LAYERS + 2)
    s = 0.1
    params = {
        "w1": s * jax.random.normal(ks[0], (INPUT_SIZE, 32), jnp.float32),
        "b1": s * jax.random.normal(ks[1], (1, 32), jnp.float32),
        "w2": s * jax.random.normal(ks[2], (32, EMBED), jnp.float32),
        "b2": s * jax.random.normal(ks[3], (1, EMBED), jnp.float32),
        "wih": [], "whh": [], "bias": [],
    }
    for l in range(N_LAYERS):
        e_in = EMBED if l == 0 else HIDDEN
        k0, k1, k2 = ks[4 + 3 * l: 7 + 3 * l]
        params["wih"].append(s * jax.random.normal(k0, (e_in, 4 * HIDDEN), jnp.float32))
        params["whh"].append(s * jax.random.normal(k1, (HIDDEN, 4 * HIDDEN), jnp.float32))
        # combined bias_ih + bias_hh
        params["bias"].append(s * jax.random.normal(k2, (1, 4 * HIDDEN), jnp.float32))
    params["wf"] = s * jax.random.normal(ks[-2], (HIDDEN, OUTPUT_SIZE), jnp.float32)
    params["bf"] = s * jax.random.normal(ks[-1], (1, OUTPUT_SIZE), jnp.float32)
    return params


# ----------------------------- main -------------------------------------------
if __name__ == "__main__":
    key = jax.random.PRNGKey(0)
    kp, kx, kh, kc = jax.random.split(key, 4)

    params = init_params(kp)
    ws = pack_params(params)                       # one-time setup, not per-call

    x = jax.random.normal(kx, (BATCH, SEQ, INPUT_SIZE), jnp.float32)
    h0 = jax.random.normal(kh, (N_LAYERS, BATCH, HIDDEN), jnp.float32)
    c0 = jax.random.normal(kc, (N_LAYERS, BATCH, HIDDEN), jnp.float32)

    out, (h_n, c_n) = rtgr_forward(ws, x, (h0, c0))
    jax.block_until_ready(out)
    jax.block_until_ready(h_n)
    jax.block_until_ready(c_n)

    ref_out, (ref_h, ref_c) = ref_forward(params, x, (h0, c0))
    assert out.shape == (BATCH * SEQ, OUTPUT_SIZE)
    assert h_n.shape == (N_LAYERS, BATCH, HIDDEN)
    assert c_n.shape == (N_LAYERS, BATCH, HIDDEN)
    assert jnp.allclose(out, ref_out, atol=1e-4), "output mismatch"
    assert jnp.allclose(h_n, ref_h, atol=1e-4), "h_n mismatch"
    assert jnp.allclose(c_n, ref_c, atol=1e-4), "c_n mismatch"

    print("KERNEL_OK")
</pallas_src>

<mosaic_0001>
module attributes {stable_mosaic.version = 11 : i64} {
  func.func @rtgr_fused_kernel(%arg0: memref<16x12xf32, #tpu.memory_space<vmem>>, %arg1: memref<192x256xf32, #tpu.memory_space<vmem>>, %arg2: memref<2x128xf32, #tpu.memory_space<vmem>>, %arg3: memref<16x128xf32, #tpu.memory_space<vmem>>, %arg4: memref<4x2x32xf32, #tpu.memory_space<vmem>>) attributes {dimension_semantics = [], scalar_prefetch = 0 : i64, scratch_operands = 0 : i64, tpu.core_type = #tpu.core_type<tc>} {
    %c0 = arith.constant 0 : index
    %c0_0 = arith.constant 0 : index
    %0 = vector.load %arg1[%c0, %c0_0] : memref<192x256xf32, #tpu.memory_space<vmem>>, vector<12x32xf32>
    %c16 = arith.constant 16 : index
    %c0_1 = arith.constant 0 : index
    %1 = vector.load %arg1[%c16, %c0_1] : memref<192x256xf32, #tpu.memory_space<vmem>>, vector<1x32xf32>
    %c24 = arith.constant 24 : index
    %c0_2 = arith.constant 0 : index
    %2 = vector.load %arg1[%c24, %c0_2] : memref<192x256xf32, #tpu.memory_space<vmem>>, vector<32x16xf32>
    %c56 = arith.constant 56 : index
    %c0_3 = arith.constant 0 : index
    %3 = vector.load %arg1[%c56, %c0_3] : memref<192x256xf32, #tpu.memory_space<vmem>>, vector<1x16xf32>
    %c64 = arith.constant 64 : index
    %c0_4 = arith.constant 0 : index
    %4 = vector.load %arg1[%c64, %c0_4] : memref<192x256xf32, #tpu.memory_space<vmem>>, vector<16x256xf32>
    %c80 = arith.constant 80 : index
    %c0_5 = arith.constant 0 : index
    %5 = vector.load %arg1[%c80, %c0_5] : memref<192x256xf32, #tpu.memory_space<vmem>>, vector<1x256xf32>
    %c88 = arith.constant 88 : index
    %c0_6 = arith.constant 0 : index
    %6 = vector.load %arg1[%c88, %c0_6] : memref<192x256xf32, #tpu.memory_space<vmem>>, vector<64x256xf32>
    %c152 = arith.constant 152 : index
    %c0_7 = arith.constant 0 : index
    %7 = vector.load %arg1[%c152, %c0_7] : memref<192x256xf32, #tpu.memory_space<vmem>>, vector<32x128xf32>
    %c184 = arith.constant 184 : index
    %c0_8 = arith.constant 0 : index
    %8 = vector.load %arg1[%c184, %c0_8] : memref<192x256xf32, #tpu.memory_space<vmem>>, vector<1x128xf32>
    %c0_9 = arith.constant 0 : index
    %c0_10 = arith.constant 0 : index
    %9 = vector.load %arg0[%c0_9, %c0_10] : memref<16x12xf32, #tpu.memory_space<vmem>>, vector<16x12xf32>
    %cst = arith.constant dense<0.000000e+00> : vector<16x32xf32>
    %10 = tpu.matmul %9, %0, %cst {dimension_numbers = #tpu.dot_dimension_numbers<[1], [0], [0], [1], [0, 0, 1, 1], [], []>} : vector<16x12xf32>, vector<12x32xf32>, vector<16x32xf32> -> vector<16x32xf32>
    %11 = vector.broadcast %1 : vector<1x32xf32> to vector<16x32xf32>
    %12 = arith.addf %10, %11 : vector<16x32xf32>
    %cst_11 = arith.constant 0.000000e+00 : f32
    %13 = vector.broadcast %cst_11 : f32 to vector<16x32xf32>
    %14 = arith.maximumf %12, %13 : vector<16x32xf32>
    %cst_12 = arith.constant dense<0.000000e+00> : vector<16x16xf32>
    %15 = tpu.matmul %14, %2, %cst_12 {dimension_numbers = #tpu.dot_dimension_numbers<[1], [0], [0], [1], [0, 0, 1, 1], [], []>} : vector<16x32xf32>, vector<32x16xf32>, vector<16x16xf32> -> vector<16x16xf32>
    %16 = vector.broadcast %3 : vector<1x16xf32> to vector<16x16xf32>
    %17 = arith.addf %15, %16 : vector<16x16xf32>
    %cst_13 = arith.constant 0.000000e+00 : f32
    %18 = vector.broadcast %cst_13 : f32 to vector<16x16xf32>
    %19 = arith.maximumf %17, %18 : vector<16x16xf32>
    %cst_14 = arith.constant dense<0.000000e+00> : vector<16x256xf32>
    %20 = tpu.matmul %19, %4, %cst_14 {dimension_numbers = #tpu.dot_dimension_numbers<[1], [0], [0], [1], [0, 0, 1, 1], [], []>} : vector<16x16xf32>, vector<16x256xf32>, vector<16x256xf32> -> vector<16x256xf32>
    %21 = vector.broadcast %5 : vector<1x256xf32> to vector<16x256xf32>
    %22 = arith.addf %20, %21 : vector<16x256xf32>
    %23 = vector.shape_cast %22 : vector<16x256xf32> to vector<2x8x256xf32>
    %24 = vector.extract_strided_slice %23 {offsets = [0, 0, 0], sizes = [2, 1, 256], strides = [1, 1, 1]} : vector<2x8x256xf32> to vector<2x1x256xf32>
    %25 = vector.shape_cast %24 : vector<2x1x256xf32> to vector<2x256xf32>
    %26 = vector.extract_strided_slice %23 {offsets = [0, 1, 0], sizes = [2, 1, 256], strides = [1, 1, 1]} : vector<2x8x256xf32> to vector<2x1x256xf32>
    %27 = vector.shape_cast %26 : vector<2x1x256xf32> to vector<2x256xf32>
    %28 = vector.extract_strided_slice %23 {offsets = [0, 2, 0], sizes = [2, 1, 256], strides = [1, 1, 1]} : vector<2x8x256xf32> to vector<2x1x256xf32>
    %29 = vector.shape_cast %28 : vector<2x1x256xf32> to vector<2x256xf32>
    %30 = vector.extract_strided_slice %23 {offsets = [0, 3, 0], sizes = [2, 1, 256], strides = [1, 1, 1]} : vector<2x8x256xf32> to vector<2x1x256xf32>
    %31 = vector.shape_cast %30 : vector<2x1x256xf32> to vector<2x256xf32>
    %32 = vector.extract_strided_slice %23 {offsets = [0, 4, 0], sizes = [2, 1, 256], strides = [1, 1, 1]} : vector<2x8x256xf32> to vector<2x1x256xf32>
    %33 = vector.shape_cast %32 : vector<2x1x256xf32> to vector<2x256xf32>
    %34 = vector.extract_strided_slice %23 {offsets = [0, 5, 0], sizes = [2, 1, 256], strides = [1, 1, 1]} : vector<2x8x256xf32> to vector<2x1x256xf32>
    %35 = vector.shape_cast %34 : vector<2x1x256xf32> to vector<2x256xf32>
    %36 = vector.extract_strided_slice %23 {offsets = [0, 6, 0], sizes = [2, 1, 256], strides = [1, 1, 1]} : vector<2x8x256xf32> to vector<2x1x256xf32>
    %37 = vector.shape_cast %36 : vector<2x1x256xf32> to vector<2x256xf32>
    %38 = vector.extract_strided_slice %23 {offsets = [0, 7, 0], sizes = [2, 1, 256], strides = [1, 1, 1]} : vector<2x8x256xf32> to vector<2x1x256xf32>
    %39 = vector.shape_cast %38 : vector<2x1x256xf32> to vector<2x256xf32>
    %c0_15 = arith.constant 0 : index
    %c0_16 = arith.constant 0 : index
    %40 = vector.load %arg2[%c0_15, %c0_16] : memref<2x128xf32, #tpu.memory_space<vmem>>, vector<2x128xf32>
    %41 = vector.extract_strided_slice %40 {offsets = [0, 0], sizes = [2, 64], strides = [1, 1]} : vector<2x128xf32> to vector<2x64xf32>
    %42 = vector.extract_strided_slice %40 {offsets = [0, 64], sizes = [2, 64], strides = [1, 1]} : vector<2x128xf32> to vector<2x64xf32>
    %43 = tpu.iota {dimensions = array<i32: 1>} : vector<2x64xi32>
    %c32_i32 = arith.constant 32 : i32
    %44 = vector.broadcast %c32_i32 : i32 to vector<2x64xi32>
    %45 = arith.cmpi slt, %43, %44 : vector<2x64xi32>
    %cst_17 = arith.constant 0.000000e+00 : f32
    %46 = vector.broadcast %cst_17 : f32 to vector<2x8x32xf32>
    %47 = tpu.iota {dimensions = array<i32: 1>} : vector<2x8x32xi32>
    %cst_18 = arith.constant dense<0.000000e+00> : vector<2x256xf32>
    %48 = tpu.matmul %41, %6, %cst_18 {dimension_numbers = #tpu.dot_dimension_numbers<[1], [0], [0], [1], [0, 0, 1, 1], [], []>} : vector<2x64xf32>, vector<64x256xf32>, vector<2x256xf32> -> vector<2x256xf32>
    %49 = arith.addf %48, %25 : vector<2x256xf32>
    %50 = arith.negf %49 : vector<2x256xf32>
    %51 = math.exp %50 : vector<2x256xf32>
    %cst_19 = arith.constant 1.000000e+00 : f32
    %52 = vector.broadcast %cst_19 : f32 to vector<2x256xf32>
    %53 = arith.addf %52, %51 : vector<2x256xf32>
    %54 = arith.divf %52, %53 : vector<2x256xf32>
    %55 = vector.extract_strided_slice %54 {offsets = [0, 0], sizes = [2, 64], strides = [1, 1]} : vector<2x256xf32> to vector<2x64xf32>
    %56 = vector.extract_strided_slice %54 {offsets = [0, 64], sizes = [2, 64], strides = [1, 1]} : vector<2x256xf32> to vector<2x64xf32>
    %57 = vector.extract_strided_slice %54 {offsets = [0, 128], sizes = [2, 64], strides = [1, 1]} : vector<2x256xf32> to vector<2x64xf32>
    %cst_20 = arith.constant 2.000000e+00 : f32
    %58 = vector.broadcast %cst_20 : f32 to vector<2x64xf32>
    %59 = arith.mulf %58, %57 : vector<2x64xf32>
    %cst_21 = arith.constant 1.000000e+00 : f32
    %60 = vector.broadcast %cst_21 : f32 to vector<2x64xf32>
    %61 = arith.subf %59, %60 : vector<2x64xf32>
    %62 = vector.extract_strided_slice %54 {offsets = [0, 192], sizes = [2, 64], strides = [1, 1]} : vector<2x256xf32> to vector<2x64xf32>
    %63 = arith.mulf %56, %42 : vector<2x64xf32>
    %64 = arith.mulf %55, %61 : vector<2x64xf32>
    %65 = arith.addf %63, %64 : vector<2x64xf32>
    %66 = math.tanh %65 : vector<2x64xf32>
    %67 = arith.mulf %62, %66 : vector<2x64xf32>
    %68 = arith.select %45, %67, %41 : vector<2x64xi1>, vector<2x64xf32>
    %69 = arith.select %45, %65, %42 : vector<2x64xi1>, vector<2x64xf32>
    %cst_22 = arith.constant dense<0.000000e+00> : vector<2x256xf32>
    %70 = tpu.matmul %68, %6, %cst_22 {dimension_numbers = #tpu.dot_dimension_numbers<[1], [0], [0], [1], [0, 0, 1, 1], [], []>} : vector<2x64xf32>, vector<64x256xf32>, vector<2x256xf32> -> vector<2x256xf32>
    %71 = arith.addf %70, %27 : vector<2x256xf32>
    %72 = arith.negf %71 : vector<2x256xf32>
    %73 = math.exp %72 : vector<2x256xf32>
    %cst_23 = arith.constant 1.000000e+00 : f32
    %74 = vector.broadcast %cst_23 : f32 to vector<2x256xf32>
    %75 = arith.addf %74, %73 : vector<2x256xf32>
    %76 = arith.divf %74, %75 : vector<2x256xf32>
    %77 = vector.extract_strided_slice %76 {offsets = [0, 0], sizes = [2, 64], strides = [1, 1]} : vector<2x256xf32> to vector<2x64xf32>
    %78 = vector.extract_strided_slice %76 {offsets = [0, 64], sizes = [2, 64], strides = [1, 1]} : vector<2x256xf32> to vector<2x64xf32>
    %79 = vector.extract_strided_slice %76 {offsets = [0, 128], sizes = [2, 64], strides = [1, 1]} : vector<2x256xf32> to vector<2x64xf32>
    %cst_24 = arith.constant 2.000000e+00 : f32
    %80 = vector.broadcast %cst_24 : f32 to vector<2x64xf32>
    %81 = arith.mulf %80, %79 : vector<2x64xf32>
    %cst_25 = arith.constant 1.000000e+00 : f32
    %82 = vector.broadcast %cst_25 : f32 to vector<2x64xf32>
    %83 = arith.subf %81, %82 : vector<2x64xf32>
    %84 = vector.extract_strided_slice %76 {offsets = [0, 192], sizes = [2, 64], strides = [1, 1]} : vector<2x256xf32> to vector<2x64xf32>
    %85 = arith.mulf %78, %69 : vector<2x64xf32>
    %86 = arith.mulf %77, %83 : vector<2x64xf32>
    %87 = arith.addf %85, %86 : vector<2x64xf32>
    %88 = math.tanh %87 : vector<2x64xf32>
    %89 = arith.mulf %84, %88 : vector<2x64xf32>
    %90 = vector.extract_strided_slice %89 {offsets = [0, 32], sizes = [2, 32], strides = [1, 1]} : vector<2x64xf32> to vector<2x32xf32>
    %c0_i32 = arith.constant 0 : i32
    %91 = vector.broadcast %c0_i32 : i32 to vector<2x8x32xi32>
    %92 = arith.cmpi eq, %47, %91 : vector<2x8x32xi32>
    %93 = vector.shape_cast %90 : vector<2x32xf32> to vector<2x1x32xf32>
    %94 = vector.shape_cast %93 : vector<2x1x32xf32> to vector<2x1x32xf32>
    %95 = vector.broadcast %94 : vector<2x1x32xf32> to vector<2x8x32xf32>
    %96 = arith.select %92, %95, %46 : vector<2x8x32xi1>, vector<2x8x32xf32>
    %cst_26 = arith.constant dense<0.000000e+00> : vector<2x256xf32>
    %97 = tpu.matmul %89, %6, %cst_26 {dimension_numbers = #tpu.dot_dimension_numbers<[1], [0], [0], [1], [0, 0, 1, 1], [], []>} : vector<2x64xf32>, vector<64x256xf32>, vector<2x256xf32> -> vector<2x256xf32>
    %98 = arith.addf %97, %29 : vector<2x256xf32>
    %99 = arith.negf %98 : vector<2x256xf32>
    %100 = math.exp %99 : vector<2x256xf32>
    %cst_27 = arith.constant 1.000000e+00 : f32
    %101 = vector.broadcast %cst_27 : f32 to vector<2x256xf32>
    %102 = arith.addf %101, %100 : vector<2x256xf32>
    %103 = arith.divf %101, %102 : vector<2x256xf32>
    %104 = vector.extract_strided_slice %103 {offsets = [0, 0], sizes = [2, 64], strides = [1, 1]} : vector<2x256xf32> to vector<2x64xf32>
    %105 = vector.extract_strided_slice %103 {offsets = [0, 64], sizes = [2, 64], strides = [1, 1]} : vector<2x256xf32> to vector<2x64xf32>
    %106 = vector.extract_strided_slice %103 {offsets = [0, 128], sizes = [2, 64], strides = [1, 1]} : vector<2x256xf32> to vector<2x64xf32>
    %cst_28 = arith.constant 2.000000e+00 : f32
    %107 = vector.broadcast %cst_28 : f32 to vector<2x64xf32>
    %108 = arith.mulf %107, %106 : vector<2x64xf32>
    %cst_29 = arith.constant 1.000000e+00 : f32
    %109 = vector.broadcast %cst_29 : f32 to vector<2x64xf32>
    %110 = arith.subf %108, %109 : vector<2x64xf32>
    %111 = vector.extract_strided_slice %103 {offsets = [0, 192], sizes = [2, 64], strides = [1, 1]} : vector<2x256xf32> to vector<2x64xf32>
    %112 = arith.mulf %105, %87 : vector<2x64xf32>
    %113 = arith.mulf %104, %110 : vector<2x64xf32>
    %114 = arith.addf %112, %113 : vector<2x64xf32>
    %115 = math.tanh %114 : vector<2x64xf32>
    %116 = arith.mulf %111, %115 : vector<2x64xf32>
    %117 = vector.extract_strided_slice %116 {offsets = [0, 32], sizes = [2, 32], strides = [1, 1]} : vector<2x64xf32> to vector<2x32xf32>
    %c1_i32 = arith.constant 1 : i32
    %118 = vector.broadcast %c1_i32 : i32 to vector<2x8x32xi32>
    %119 = arith.cmpi eq, %47, %118 : vector<2x8x32xi32>
    %120 = vector.shape_cast %117 : vector<2x32xf32> to vector<2x1x32xf32>
    %121 = vector.shape_cast %120 : vector<2x1x32xf32> to vector<2x1x32xf32>
    %122 = vector.broadcast %121 : vector<2x1x32xf32> to vector<2x8x32xf32>
    %123 = arith.select %119, %122, %96 : vector<2x8x32xi1>, vector<2x8x32xf32>
    %cst_30 = arith.constant dense<0.000000e+00> : vector<2x256xf32>
    %124 = tpu.matmul %116, %6, %cst_30 {dimension_numbers = #tpu.dot_dimension_numbers<[1], [0], [0], [1], [0, 0, 1, 1], [], []>} : vector<2x64xf32>, vector<64x256xf32>, vector<2x256xf32> -> vector<2x256xf32>
    %125 = arith.addf %124, %31 : vector<2x256xf32>
    %126 = arith.negf %125 : vector<2x256xf32>
    %127 = math.exp %126 : vector<2x256xf32>
    %cst_31 = arith.constant 1.000000e+00 : f32
    %128 = vector.broadcast %cst_31 : f32 to vector<2x256xf32>
    %129 = arith.addf %128, %127 : vector<2x256xf32>
    %130 = arith.divf %128, %129 : vector<2x256xf32>
    %131 = vector.extract_strided_slice %130 {offsets = [0, 0], sizes = [2, 64], strides = [1, 1]} : vector<2x256xf32> to vector<2x64xf32>
    %132 = vector.extract_strided_slice %130 {offsets = [0, 64], sizes = [2, 64], strides = [1, 1]} : vector<2x256xf32> to vector<2x64xf32>
    %133 = vector.extract_strided_slice %130 {offsets = [0, 128], sizes = [2, 64], strides = [1, 1]} : vector<2x256xf32> to vector<2x64xf32>
    %cst_32 = arith.constant 2.000000e+00 : f32
    %134 = vector.broadcast %cst_32 : f32 to vector<2x64xf32>
    %135 = arith.mulf %134, %133 : vector<2x64xf32>
    %cst_33 = arith.constant 1.000000e+00 : f32
    %136 = vector.broadcast %cst_33 : f32 to vector<2x64xf32>
    %137 = arith.subf %135, %136 : vector<2x64xf32>
    %138 = vector.extract_strided_slice %130 {offsets = [0, 192], sizes = [2, 64], strides = [1, 1]} : vector<2x256xf32> to vector<2x64xf32>
    %139 = arith.mulf %132, %114 : vector<2x64xf32>
    %140 = arith.mulf %131, %137 : vector<2x64xf32>
    %141 = arith.addf %139, %140 : vector<2x64xf32>
    %142 = math.tanh %141 : vector<2x64xf32>
    %143 = arith.mulf %138, %142 : vector<2x64xf32>
    %144 = vector.extract_strided_slice %143 {offsets = [0, 32], sizes = [2, 32], strides = [1, 1]} : vector<2x64xf32> to vector<2x32xf32>
    %c2_i32 = arith.constant 2 : i32
    %145 = vector.broadcast %c2_i32 : i32 to vector<2x8x32xi32>
    %146 = arith.cmpi eq, %47, %145 : vector<2x8x32xi32>
    %147 = vector.shape_cast %144 : vector<2x32xf32> to vector<2x1x32xf32>
    %148 = vector.shape_cast %147 : vector<2x1x32xf32> to vector<2x1x32xf32>
    %149 = vector.broadcast %148 : vector<2x1x32xf32> to vector<2x8x32xf32>
    %150 = arith.select %146, %149, %123 : vector<2x8x32xi1>, vector<2x8x32xf32>
    %cst_34 = arith.constant dense<0.000000e+00> : vector<2x256xf32>
    %151 = tpu.matmul %143, %6, %cst_34 {dimension_numbers = #tpu.dot_dimension_numbers<[1], [0], [0], [1], [0, 0, 1, 1], [], []>} : vector<2x64xf32>, vector<64x256xf32>, vector<2x256xf32> -> vector<2x256xf32>
    %152 = arith.addf %151, %33 : vector<2x256xf32>
    %153 = arith.negf %152 : vector<2x256xf32>
    %154 = math.exp %153 : vector<2x256xf32>
    %cst_35 = arith.constant 1.000000e+00 : f32
    %155 = vector.broadcast %cst_35 : f32 to vector<2x256xf32>
    %156 = arith.addf %155, %154 : vector<2x256xf32>
    %157 = arith.divf %155, %156 : vector<2x256xf32>
    %158 = vector.extract_strided_slice %157 {offsets = [0, 0], sizes = [2, 64], strides = [1, 1]} : vector<2x256xf32> to vector<2x64xf32>
    %159 = vector.extract_strided_slice %157 {offsets = [0, 64], sizes = [2, 64], strides = [1, 1]} : vector<2x256xf32> to vector<2x64xf32>
    %160 = vector.extract_strided_slice %157 {offsets = [0, 128], sizes = [2, 64], strides = [1, 1]} : vector<2x256xf32> to vector<2x64xf32>
    %cst_36 = arith.constant 2.000000e+00 : f32
    %161 = vector.broadcast %cst_36 : f32 to vector<2x64xf32>
    %162 = arith.mulf %161, %160 : vector<2x64xf32>
    %cst_37 = arith.constant 1.000000e+00 : f32
    %163 = vector.broadcast %cst_37 : f32 to vector<2x64xf32>
    %164 = arith.subf %162, %163 : vector<2x64xf32>
    %165 = vector.extract_strided_slice %157 {offsets = [0, 192], sizes = [2, 64], strides = [1, 1]} : vector<2x256xf32> to vector<2x64xf32>
    %166 = arith.mulf %159, %141 : vector<2x64xf32>
    %167 = arith.mulf %158, %164 : vector<2x64xf32>
    %168 = arith.addf %166, %167 : vector<2x64xf32>
    %169 = math.tanh %168 : vector<2x64xf32>
    %170 = arith.mulf %165, %169 : vector<2x64xf32>
    %171 = vector.extract_strided_slice %170 {offsets = [0, 32], sizes = [2, 32], strides = [1, 1]} : vector<2x64xf32> to vector<2x32xf32>
    %c3_i32 = arith.constant 3 : i32
    %172 = vector.broadcast %c3_i32 : i32 to vector<2x8x32xi32>
    %173 = arith.cmpi eq, %47, %172 : vector<2x8x32xi32>
    %174 = vector.shape_cast %171 : vector<2x32xf32> to vector<2x1x32xf32>
    %175 = vector.shape_cast %174 : vector<2x1x32xf32> to vector<2x1x32xf32>
    %176 = vector.broadcast %175 : vector<2x1x32xf32> to vector<2x8x32xf32>
    %177 = arith.select %173, %176, %150 : vector<2x8x32xi1>, vector<2x8x32xf32>
    %cst_38 = arith.constant dense<0.000000e+00> : vector<2x256xf32>
    %178 = tpu.matmul %170, %6, %cst_38 {dimension_numbers = #tpu.dot_dimension_numbers<[1], [0], [0], [1], [0, 0, 1, 1], [], []>} : vector<2x64xf32>, vector<64x256xf32>, vector<2x256xf32> -> vector<2x256xf32>
    %179 = arith.addf %178, %35 : vector<2x256xf32>
    %180 = arith.negf %179 : vector<2x256xf32>
    %181 = math.exp %180 : vector<2x256xf32>
    %cst_39 = arith.constant 1.000000e+00 : f32
    %182 = vector.broadcast %cst_39 : f32 to vector<2x256xf32>
    %183 = arith.addf %182, %181 : vector<2x256xf32>
    %184 = arith.divf %182, %183 : vector<2x256xf32>
    %185 = vector.extract_strided_slice %184 {offsets = [0, 0], sizes = [2, 64], strides = [1, 1]} : vector<2x256xf32> to vector<2x64xf32>
    %186 = vector.extract_strided_slice %184 {offsets = [0, 64], sizes = [2, 64], strides = [1, 1]} : vector<2x256xf32> to vector<2x64xf32>
    %187 = vector.extract_strided_slice %184 {offsets = [0, 128], sizes = [2, 64], strides = [1, 1]} : vector<2x256xf32> to vector<2x64xf32>
    %cst_40 = arith.constant 2.000000e+00 : f32
    %188 = vector.broadcast %cst_40 : f32 to vector<2x64xf32>
    %189 = arith.mulf %188, %187 : vector<2x64xf32>
    %cst_41 = arith.constant 1.000000e+00 : f32
    %190 = vector.broadcast %cst_41 : f32 to vector<2x64xf32>
    %191 = arith.subf %189, %190 : vector<2x64xf32>
    %192 = vector.extract_strided_slice %184 {offsets = [0, 192], sizes = [2, 64], strides = [1, 1]} : vector<2x256xf32> to vector<2x64xf32>
    %193 = arith.mulf %186, %168 : vector<2x64xf32>
    %194 = arith.mulf %185, %191 : vector<2x64xf32>
    %195 = arith.addf %193, %194 : vector<2x64xf32>
    %196 = math.tanh %195 : vector<2x64xf32>
    %197 = arith.mulf %192, %196 : vector<2x64xf32>
    %198 = vector.extract_strided_slice %197 {offsets = [0, 32], sizes = [2, 32], strides = [1, 1]} : vector<2x64xf32> to vector<2x32xf32>
    %c4_i32 = arith.constant 4 : i32
    %199 = vector.broadcast %c4_i32 : i32 to vector<2x8x32xi32>
    %200 = arith.cmpi eq, %47, %199 : vector<2x8x32xi32>
    %201 = vector.shape_cast %198 : vector<2x32xf32> to vector<2x1x32xf32>
    %202 = vector.shape_cast %201 : vector<2x1x32xf32> to vector<2x1x32xf32>
    %203 = vector.broadcast %202 : vector<2x1x32xf32> to vector<2x8x32xf32>
    %204 = arith.select %200, %203, %177 : vector<2x8x32xi1>, vector<2x8x32xf32>
    %cst_42 = arith.constant dense<0.000000e+00> : vector<2x256xf32>
    %205 = tpu.matmul %197, %6, %cst_42 {dimension_numbers = #tpu.dot_dimension_numbers<[1], [0], [0], [1], [0, 0, 1, 1], [], []>} : vector<2x64xf32>, vector<64x256xf32>, vector<2x256xf32> -> vector<2x256xf32>
    %206 = arith.addf %205, %37 : vector<2x256xf32>
    %207 = arith.negf %206 : vector<2x256xf32>
    %208 = math.exp %207 : vector<2x256xf32>
    %cst_43 = arith.constant 1.000000e+00 : f32
    %209 = vector.broadcast %cst_43 : f32 to vector<2x256xf32>
    %210 = arith.addf %209, %208 : vector<2x256xf32>
    %211 = arith.divf %209, %210 : vector<2x256xf32>
    %212 = vector.extract_strided_slice %211 {offsets = [0, 0], sizes = [2, 64], strides = [1, 1]} : vector<2x256xf32> to vector<2x64xf32>
    %213 = vector.extract_strided_slice %211 {offsets = [0, 64], sizes = [2, 64], strides = [1, 1]} : vector<2x256xf32> to vector<2x64xf32>
    %214 = vector.extract_strided_slice %211 {offsets = [0, 128], sizes = [2, 64], strides = [1, 1]} : vector<2x256xf32> to vector<2x64xf32>
    %cst_44 = arith.constant 2.000000e+00 : f32
    %215 = vector.broadcast %cst_44 : f32 to vector<2x64xf32>
    %216 = arith.mulf %215, %214 : vector<2x64xf32>
    %cst_45 = arith.constant 1.000000e+00 : f32
    %217 = vector.broadcast %cst_45 : f32 to vector<2x64xf32>
    %218 = arith.subf %216, %217 : vector<2x64xf32>
    %219 = vector.extract_strided_slice %211 {offsets = [0, 192], sizes = [2, 64], strides = [1, 1]} : vector<2x256xf32> to vector<2x64xf32>
    %220 = arith.mulf %213, %195 : vector<2x64xf32>
    %221 = arith.mulf %212, %218 : vector<2x64xf32>
    %222 = arith.addf %220, %221 : vector<2x64xf32>
    %223 = math.tanh %222 : vector<2x64xf32>
    %224 = arith.mulf %219, %223 : vector<2x64xf32>
    %225 = vector.extract_strided_slice %224 {offsets = [0, 32], sizes = [2, 32], strides = [1, 1]} : vector<2x64xf32> to vector<2x32xf32>
    %c5_i32 = arith.constant 5 : i32
    %226 = vector.broadcast %c5_i32 : i32 to vector<2x8x32xi32>
    %227 = arith.cmpi eq, %47, %226 : vector<2x8x32xi32>
    %228 = vector.shape_cast %225 : vector<2x32xf32> to vector<2x1x32xf32>
    %229 = vector.shape_cast %228 : vector<2x1x32xf32> to vector<2x1x32xf32>
    %230 = vector.broadcast %229 : vector<2x1x32xf32> to vector<2x8x32xf32>
    %231 = arith.select %227, %230, %204 : vector<2x8x32xi1>, vector<2x8x32xf32>
    %cst_46 = arith.constant dense<0.000000e+00> : vector<2x256xf32>
    %232 = tpu.matmul %224, %6, %cst_46 {dimension_numbers = #tpu.dot_dimension_numbers<[1], [0], [0], [1], [0, 0, 1, 1], [], []>} : vector<2x64xf32>, vector<64x256xf32>, vector<2x256xf32> -> vector<2x256xf32>
    %233 = arith.addf %232, %39 : vector<2x256xf32>
    %234 = arith.negf %233 : vector<2x256xf32>
    %235 = math.exp %234 : vector<2x256xf32>
    %cst_47 = arith.constant 1.000000e+00 : f32
    %236 = vector.broadcast %cst_47 : f32 to vector<2x256xf32>
    %237 = arith.addf %236, %235 : vector<2x256xf32>
    %238 = arith.divf %236, %237 : vector<2x256xf32>
    %239 = vector.extract_strided_slice %238 {offsets = [0, 0], sizes = [2, 64], strides = [1, 1]} : vector<2x256xf32> to vector<2x64xf32>
    %240 = vector.extract_strided_slice %238 {offsets = [0, 64], sizes = [2, 64], strides = [1, 1]} : vector<2x256xf32> to vector<2x64xf32>
    %241 = vector.extract_strided_slice %238 {offsets = [0, 128], sizes = [2, 64], strides = [1, 1]} : vector<2x256xf32> to vector<2x64xf32>
    %cst_48 = arith.constant 2.000000e+00 : f32
    %242 = vector.broadcast %cst_48 : f32 to vector<2x64xf32>
    %243 = arith.mulf %242, %241 : vector<2x64xf32>
    %cst_49 = arith.constant 1.000000e+00 : f32
    %244 = vector.broadcast %cst_49 : f32 to vector<2x64xf32>
    %245 = arith.subf %243, %244 : vector<2x64xf32>
    %246 = vector.extract_strided_slice %238 {offsets = [0, 192], sizes = [2, 64], strides = [1, 1]} : vector<2x256xf32> to vector<2x64xf32>
    %247 = arith.mulf %240, %222 : vector<2x64xf32>
    %248 = arith.mulf %239, %245 : vector<2x64xf32>
    %249 = arith.addf %247, %248 : vector<2x64xf32>
    %250 = math.tanh %249 : vector<2x64xf32>
    %251 = arith.mulf %246, %250 : vector<2x64xf32>
    %252 = vector.extract_strided_slice %251 {offsets = [0, 32], sizes = [2, 32], strides = [1, 1]} : vector<2x64xf32> to vector<2x32xf32>
    %c6_i32 = arith.constant 6 : i32
    %253 = vector.broadcast %c6_i32 : i32 to vector<2x8x32xi32>
    %254 = arith.cmpi eq, %47, %253 : vector<2x8x32xi32>
    %255 = vector.shape_cast %252 : vector<2x32xf32> to vector<2x1x32xf32>
    %256 = vector.shape_cast %255 : vector<2x1x32xf32> to vector<2x1x32xf32>
    %257 = vector.broadcast %256 : vector<2x1x32xf32> to vector<2x8x32xf32>
    %258 = arith.select %254, %257, %231 : vector<2x8x32xi1>, vector<2x8x32xf32>
    %cst_50 = arith.constant dense<0.000000e+00> : vector<2x256xf32>
    %259 = tpu.matmul %251, %6, %cst_50 {dimension_numbers = #tpu.dot_dimension_numbers<[1], [0], [0], [1], [0, 0, 1, 1], [], []>} : vector<2x64xf32>, vector<64x256xf32>, vector<2x256xf32> -> vector<2x256xf32>
    %260 = arith.addf %259, %25 : vector<2x256xf32>
    %261 = arith.negf %260 : vector<2x256xf32>
    %262 = math.exp %261 : vector<2x256xf32>
    %cst_51 = arith.constant 1.000000e+00 : f32
    %263 = vector.broadcast %cst_51 : f32 to vector<2x256xf32>
    %264 = arith.addf %263, %262 : vector<2x256xf32>
    %265 = arith.divf %263, %264 : vector<2x256xf32>
    %266 = vector.extract_strided_slice %265 {offsets = [0, 0], sizes = [2, 64], strides = [1, 1]} : vector<2x256xf32> to vector<2x64xf32>
    %267 = vector.extract_strided_slice %265 {offsets = [0, 64], sizes = [2, 64], strides = [1, 1]} : vector<2x256xf32> to vector<2x64xf32>
    %268 = vector.extract_strided_slice %265 {offsets = [0, 128], sizes = [2, 64], strides = [1, 1]} : vector<2x256xf32> to vector<2x64xf32>
    %cst_52 = arith.constant 2.000000e+00 : f32
    %269 = vector.broadcast %cst_52 : f32 to vector<2x64xf32>
    %270 = arith.mulf %269, %268 : vector<2x64xf32>
    %cst_53 = arith.constant 1.000000e+00 : f32
    %271 = vector.broadcast %cst_53 : f32 to vector<2x64xf32>
    %272 = arith.subf %270, %271 : vector<2x64xf32>
    %273 = vector.extract_strided_slice %265 {offsets = [0, 192], sizes = [2, 64], strides = [1, 1]} : vector<2x256xf32> to vector<2x64xf32>
    %274 = arith.mulf %267, %249 : vector<2x64xf32>
    %275 = arith.mulf %266, %272 : vector<2x64xf32>
    %276 = arith.addf %274, %275 : vector<2x64xf32>
    %277 = math.tanh %276 : vector<2x64xf32>
    %278 = arith.mulf %273, %277 : vector<2x64xf32>
    %279 = arith.select %45, %251, %278 : vector<2x64xi1>, vector<2x64xf32>
    %280 = arith.select %45, %249, %276 : vector<2x64xi1>, vector<2x64xf32>
    %281 = vector.extract_strided_slice %279 {offsets = [0, 32], sizes = [2, 32], strides = [1, 1]} : vector<2x64xf32> to vector<2x32xf32>
    %c7_i32 = arith.constant 7 : i32
    %282 = vector.broadcast %c7_i32 : i32 to vector<2x8x32xi32>
    %283 = arith.cmpi eq, %47, %282 : vector<2x8x32xi32>
    %284 = vector.shape_cast %281 : vector<2x32xf32> to vector<2x1x32xf32>
    %285 = vector.shape_cast %284 : vector<2x1x32xf32> to vector<2x1x32xf32>
    %286 = vector.broadcast %285 : vector<2x1x32xf32> to vector<2x8x32xf32>
    %287 = arith.select %283, %286, %258 : vector<2x8x32xi1>, vector<2x8x32xf32>
    %288 = vector.shape_cast %287 : vector<2x8x32xf32> to vector<16x32xf32>
    %cst_54 = arith.constant dense<0.000000e+00> : vector<16x128xf32>
    %289 = tpu.matmul %288, %7, %cst_54 {dimension_numbers = #tpu.dot_dimension_numbers<[1], [0], [0], [1], [0, 0, 1, 1], [], []>} : vector<16x32xf32>, vector<32x128xf32>, vector<16x128xf32> -> vector<16x128xf32>
    %290 = vector.broadcast %8 : vector<1x128xf32> to vector<16x128xf32>
    %291 = arith.addf %289, %290 : vector<16x128xf32>
    %c0_55 = arith.constant 0 : index
    %c0_56 = arith.constant 0 : index
    %292 = vector.load %arg3[%c0_55, %c0_56] : memref<16x128xf32, #tpu.memory_space<vmem>>, vector<16x128xf32>
    tpu.vector_store %arg3[%c0_55, %c0_56], %291 {strides = array<i32>} : memref<16x128xf32, #tpu.memory_space<vmem>>, vector<16x128xf32>,
    %293 = vector.extract_strided_slice %279 {offsets = [0, 0], sizes = [2, 32], strides = [1, 1]} : vector<2x64xf32> to vector<2x32xf32>
    %c0_57 = arith.constant 0 : index
    %c0_58 = arith.constant 0 : index
    %c0_59 = arith.constant 0 : index
    %294 = vector.load %arg4[%c0_57, %c0_58, %c0_59] : memref<4x2x32xf32, #tpu.memory_space<vmem>>, vector<1x2x32xf32>
    %295 = vector.shape_cast %294 : vector<1x2x32xf32> to vector<2x32xf32>
    %296 = vector.shape_cast %293 : vector<2x32xf32> to vector<1x2x32xf32>
    tpu.vector_store %arg4[%c0_57, %c0_58, %c0_59], %296 {strides = array<i32>} : memref<4x2x32xf32, #tpu.memory_space<vmem>>, vector<1x2x32xf32>,
    %297 = vector.extract_strided_slice %279 {offsets = [0, 32], sizes = [2, 32], strides = [1, 1]} : vector<2x64xf32> to vector<2x32xf32>
    %c1 = arith.constant 1 : index
    %c0_60 = arith.constant 0 : index
    %c0_61 = arith.constant 0 : index
    %298 = vector.load %arg4[%c1, %c0_60, %c0_61] : memref<4x2x32xf32, #tpu.memory_space<vmem>>, vector<1x2x32xf32>
    %299 = vector.shape_cast %298 : vector<1x2x32xf32> to vector<2x32xf32>
    %300 = vector.shape_cast %297 : vector<2x32xf32> to vector<1x2x32xf32>
    tpu.vector_store %arg4[%c1, %c0_60, %c0_61], %300 {strides = array<i32>} : memref<4x2x32xf32, #tpu.memory_space<vmem>>, vector<1x2x32xf32>,
    %301 = vector.extract_strided_slice %280 {offsets = [0, 0], sizes = [2, 32], strides = [1, 1]} : vector<2x64xf32> to vector<2x32xf32>
    %c2 = arith.constant 2 : index
    %c0_62 = arith.constant 0 : index
    %c0_63 = arith.constant 0 : index
    %302 = vector.load %arg4[%c2, %c0_62, %c0_63] : memref<4x2x32xf32, #tpu.memory_space<vmem>>, vector<1x2x32xf32>
    %303 = vector.shape_cast %302 : vector<1x2x32xf32> to vector<2x32xf32>
    %304 = vector.shape_cast %301 : vector<2x32xf32> to vector<1x2x32xf32>
    tpu.vector_store %arg4[%c2, %c0_62, %c0_63], %304 {strides = array<i32>} : memref<4x2x32xf32, #tpu.memory_space<vmem>>, vector<1x2x32xf32>,
    %305 = vector.extract_strided_slice %280 {offsets = [0, 32], sizes = [2, 32], strides = [1, 1]} : vector<2x64xf32> to vector<2x32xf32>
    %c3 = arith.constant 3 : index
    %c0_64 = arith.constant 0 : index
    %c0_65 = arith.constant 0 : index
    %306 = vector.load %arg4[%c3, %c0_64, %c0_65] : memref<4x2x32xf32, #tpu.memory_space<vmem>>, vector<1x2x32xf32>
    %307 = vector.shape_cast %306 : vector<1x2x32xf32> to vector<2x32xf32>
    %308 = vector.shape_cast %305 : vector<2x32xf32> to vector<1x2x32xf32>
    tpu.vector_store %arg4[%c3, %c0_64, %c0_65], %308 {strides = array<i32>} : memref<4x2x32xf32, #tpu.memory_space<vmem>>, vector<1x2x32xf32>,
    return
  }
}

</mosaic_0001>

<bundles_post_ra>
// kernel: rtgr_forward.1
= control target key start
LH: loop header
LB: loop body
LE: loop exit
PB: predicated region body
PF: predicated region fallthrough
CT: control target
= control target key end

     0   :  { %10 = vsyncpa [#allocation3], 0  ;;  %s1453_s18 = smov [#allocation2]   ;;  %s1454_s20 = smov 256   ;;  %s1898_s0 = inlined_call_operand.vmem [shape: f32[16,12], index: 0, kind: input, shape index: {}]   ;;  %s1899_s1 = inlined_call_operand.hbm [shape: f32[192,256], index: 1, kind: input, shape index: {}]   ;;  %s1900_s2 = inlined_call_operand.vmem [shape: f32[2,128], index: 2, kind: input, shape index: {}]   ;;  %s1901_s3 = inlined_call_operand.vmem [shape: f32[16,128], index: 3, kind: output, shape index: {0}]   ;;  %s1902_s4 = inlined_call_operand.vmem [shape: f32[4,2,32], index: 4, kind: output, shape index: {1}]  }
   0x1   :  { %s17_s17 = sshll.u32 %s1899_s1, 4  ;;  %s19_s19 = sshll.u32 %s1453_s18, 4  ;;  %s18_s17 = int_to_ptr.hbm [resolvable:$true] %s17_s17  ;;  %s20_s19 = int_to_ptr.vmem [resolvable:$true] %s19_s19 }
   0x2   :  { %s1455_s21 = smov 16  }
   0x3   :  { %25 = dma.hbm_to_vmem [thread:$0]  %s18_s17, 6144, %s20_s19, [#allocation3], %s1454_s20, %s1454_s20, %s1455_s21  }
   0x4   :  { %1451 = dma.done.wait [#allocation3], 6144  }
   0x5   :  { %1452 = vsyncadd [#allocation3], 4294961152  ;;  %vm76_vm0 = vcmask 1043456   ;;  %v33_v0 = vld [vmem:[#allocation2 + $0x10] sm:$0xf]  ;;  %v32_v1 = vld [vmem:[#allocation2] sm:$0xff] }
   0x6   :  { %1273 = vmatpush.msk.msra.mxu0 %vm76_vm0, %v33_v0  ;;  %v67_v2 = vld [vmem:[%s1898_s0] sm:$0xff]  ;;  %vm69_vm1 = vcmask 97280   ;;  %v68_v4 = vld [vmem:[%s1898_s0 + $0x8] sm:$0xff]  ;;  %v37_v5 = vld [vmem:[#allocation2 + $0x50] sm:$0xff]  ;;  %vm105_vm2 = vcmask 261120   ;;  %vm212_vm3 = vcmask 523264  }
   0x7   :  { %v38_v3 = vld [vmem:[#allocation2 + $0x60] sm:$0xff]  ;;  %v35_v7 = vld [vmem:[#allocation2 + $0x30] sm:$0xff]  ;;  %v43_v16 = vld [vmem:[#allocation2 + $0x98] sm:$0xff]  ;;  %vm142_vm4 = vcmask 130048   ;;  %vm206_vm5 = vcmask 1041409   ;;  %s1457_s28 = smov 96  }
   0x8   :  { %124 = vmatpush.msra.mxu1 %v38_v3  ;;  %95 = vmatpush.msra.mxu0 %v32_v1  ;;  %v36_v6 = vld [vmem:[#allocation2 + $0x40] sm:$0xff]  ;;  %v42_v15 = vld [vmem:[#allocation2 + $0x90] sm:$0xff]  ;;  %v41_v18 = vld [vmem:[#allocation2 + $0x88] sm:$0xff] }
   0x9   :  { %1274 = vmatmul.msk.f32.vlgmr.msra.gmra.mxu0 %vm69_vm1, %v67_v2  ;;  %v34_v8 = vld [vmem:[#allocation2 + $0x20] ss:$0 sm:$0xff]  ;;  %163 = vmatpush.msra.mxu2 %v42_v15  ;;  %v1494_v19 = vld [vmem:[#allocation2 + $0x128] sm:$0xff]  ;;  %v1496_v20 = vld [vmem:[#allocation2 + $0x118] sm:$0xff] }
   0xa   :  { %125 = vmatpush.msra.mxu1 %v37_v5  ;;  %186 = vmatpush.msra.mxu3 %v43_v16  ;;  %v40_v17 = vld [vmem:[#allocation2 + $0x80] sm:$0xff]  ;;  %v1505_v22 = vld [vmem:[#allocation2 + $0x108] sm:$0xff]  ;;  %v1509_v23 = vld [vmem:[#allocation2 + $0x110] sm:$0xff] }
   0xb   :  { %164 = vmatpush.msra.mxu2 %v40_v17  ;;  %v1501_v21 = vld [vmem:[#allocation2 + $0x120] sm:$0xff]  ;;  %v1513_v24 = vld [vmem:[#allocation2 + $0xf8] sm:$0xff]  ;;  %v1521_v26 = vld [vmem:[#allocation2 + $0xe8] sm:$0xff] }
   0xc   :  { %126 = vmatpush.msra.mxu1 %v36_v6  ;;  %187 = vmatpush.msra.mxu3 %v41_v18  ;;  %v1517_v25 = vld [vmem:[#allocation2 + $0x100] sm:$0xff]  ;;  %v1523_v27 = vld [vmem:[#allocation2 + $0xf0] sm:$0xff]  ;;  %v1525_v28 = vld [vmem:[#allocation2 + $0xd8] sm:$0xff] }
   0xd   :  { %244 = vmatpush.msrb.mxu2 %v1494_v19  ;;  %224 = vmatpush.msrb.mxu0 %v1501_v21  ;;  %v1529_v29 = vld [vmem:[#allocation2 + $0xe0] sm:$0xff]  ;;  %v1533_v30 = vld [vmem:[#allocation2 + $0xc8] sm:$0xff]  ;;  %v1537_v31 = vld [vmem:[#allocation2 + $0xd0] sm:$0xff] }
   0xe   :  { %127 = vmatpush.msra.mxu1 %v35_v7  ;;  %335 = vmatpush.msrb.mxu3 %v1501_v21  ;;  %v1541_v32 = vld [vmem:[#allocation2 + $0xb8] sm:$0xff]  ;;  %v1545_v33 = vld [vmem:[#allocation2 + $0xc0] sm:$0xff]  ;;  %v1553_v34 = vld [vmem:[#allocation2 + $0xb0] sm:$0xff] }
   0xf   :  { %245 = vmatpush.msrb.mxu2 %v1496_v20  ;;  %225 = vmatpush.msrb.mxu0 %v1509_v23  ;;  %v1560_v35 = vld [vmem:[%s1900_s2] sm:$0x3]  ;;  %v39_v36 = vld [vmem:[#allocation2 + $0x70] ss:$0 sm:$0xff]  ;;  %s1456_s2 = smov 64  }
  0x10   :  { %355 = vmatpush.msrb.mxu1 %v1494_v19  ;;  %336 = vmatpush.msrb.mxu3 %v1509_v23  ;;  %v45_v43 = vld [vmem:[#allocation2 + $0xa0] ss:$8 sm:$0x3] }
  0x11   :  { %1275 = vmatmul.msk.f32.gmra.mxu0 %vm69_vm1, %v68_v4  ;;  %246 = vmatpush.msrb.mxu2 %v1505_v22  ;;  %v138_v44 = vperm.slane %v45_v43, 0  ;;  %v139_v45 = vperm.slane %v45_v43, 1 }
  0x12   :  { %356 = vmatpush.msrb.mxu1 %v1496_v20  ;;  %226 = vmatpush.msrb.mxu0 %v1517_v25 }
  0x13   :  { %247 = vmatpush.msrb.mxu2 %v1513_v24  ;;  %337 = vmatpush.msrb.mxu3 %v1517_v25 }
  0x14   :  { %357 = vmatpush.msrb.mxu1 %v1505_v22  ;;  %227 = vmatpush.msrb.mxu0 %v1523_v27 }
  0x15   :  { %248 = vmatpush.msrb.mxu2 %v1521_v26  ;;  %338 = vmatpush.msrb.mxu3 %v1523_v27 }
  0x16   :  { %358 = vmatpush.msrb.mxu1 %v1513_v24  ;;  %228 = vmatpush.msrb.mxu0 %v1529_v29 }
  0x17   :  { %249 = vmatpush.msrb.mxu2 %v1525_v28  ;;  %339 = vmatpush.msrb.mxu3 %v1529_v29 }
  0x18   :  { %359 = vmatpush.msrb.mxu1 %v1521_v26  ;;  %229 = vmatpush.msrb.mxu0 %v1537_v31 }
  0x19   :  { %250 = vmatpush.msrb.mxu2 %v1533_v30  ;;  %340 = vmatpush.msrb.mxu3 %v1537_v31 }
  0x1a   :  { %360 = vmatpush.msrb.mxu1 %v1525_v28  ;;  %230 = vmatpush.msrb.mxu0 %v1545_v33 }
  0x1b   :  { %251 = vmatpush.msrb.mxu2 %v1541_v32  ;;  %341 = vmatpush.msrb.mxu3 %v1545_v33 }
  0x1c   :  { %361 = vmatpush.msrb.mxu1 %v1533_v30  ;;  %231 = vmatpush.msrb.mxu0 %v1553_v34 }
  0x1d   :  { %342 = vmatpush.msrb.mxu3 %v1553_v34  ;;  %1282 = vmatmul.msk.f32.vlgmr.msrb.gmra.mxu0 %vm212_vm3, %v1560_v35 }
  0x1e   :  { %362 = vmatpush.msrb.mxu1 %v1541_v32  ;;  %449 = vmatpush.msra.mxu0 %v1501_v21 }
  0x20   :  { %450 = vmatpush.msra.mxu0 %v1509_v23 }
  0x22   :  { %451 = vmatpush.msra.mxu0 %v1517_v25 }
  0x24   :  { %452 = vmatpush.msra.mxu0 %v1523_v27 }
  0x26   :  { %453 = vmatpush.msra.mxu0 %v1529_v29 }
  0x28   :  { %454 = vmatpush.msra.mxu0 %v1537_v31 }
  0x2a   :  { %455 = vmatpush.msra.mxu0 %v1545_v33 }
  0x2c   :  { %456 = vmatpush.msra.mxu0 %v1553_v34 }
  0x2e   :  { %669 = vmatpush.msrb.mxu0 %v1501_v21 }
  0x30   :  { %670 = vmatpush.msrb.mxu0 %v1509_v23 }
  0x32   :  { %671 = vmatpush.msrb.mxu0 %v1517_v25 }
  0x34   :  { %672 = vmatpush.msrb.mxu0 %v1523_v27 }
  0x36   :  { %673 = vmatpush.msrb.mxu0 %v1529_v29 }
  0x38   :  { %674 = vmatpush.msrb.mxu0 %v1537_v31 }
  0x3a   :  { %675 = vmatpush.msrb.mxu0 %v1545_v33 }
  0x3c   :  { %676 = vmatpush.msrb.mxu0 %v1553_v34 }
  0x86   :  { %v97_v9 = vpop.f32.mrf.mxu0 }
  0x87   :  { %v98_v10 = vadd.f32 %v97_v9, %v34_v8 }
  0x89   :  { %v103_v11 = vmax.f32 %v98_v10, 0.0 }
  0x8b   :  { %1276 = vmatmul.msk.f32.vlgmr.msra.gmra.mxu1 %vm105_vm2, %v103_v11 }
  0x8c   :  { %579 = vmatpush.msra.mxu1 %v1494_v19 }
  0x8e   :  { %v100_v12 = vpop.f32.mrf.mxu0  ;;  %580 = vmatpush.msra.mxu1 %v1496_v20 }
  0x8f   :  { %v101_v13 = vadd.f32 %v100_v12, %v34_v8 }
  0x90   :  { %581 = vmatpush.msra.mxu1 %v1505_v22 }
  0x91   :  { %v104_v14 = vmax.f32 %v101_v13, 0.0 }
  0x92   :  { %582 = vmatpush.msra.mxu1 %v1513_v24 }
  0x93   :  { %1277 = vmatmul.msk.f32.gmra.mxu1 %vm105_vm2, %v104_v14 }
  0x94   :  { %583 = vmatpush.msra.mxu1 %v1521_v26 }
  0x96   :  { %584 = vmatpush.msra.mxu1 %v1525_v28 }
  0x98   :  { %585 = vmatpush.msra.mxu1 %v1533_v30 }
  0x9a   :  { %586 = vmatpush.msra.mxu1 %v1541_v32  ;;  %v233_v5 = vpop.f32.mrf.mxu0 }
 0x108   :  { %v129_v37 = vpop.f32.mrf.mxu1 }
 0x109   :  { %v130_v38 = vadd.f32 %v129_v37, %v39_v36 }
 0x10b   :  { %v135_v39 = vmax.f32 %v130_v38, 0.0 }
 0x10d   :  { %1278 = vmatmul.msk.f32.vlgmr.msra.gmra.mxu2 %vm142_vm4, %v135_v39  ;;  %1280 = vmatmul.msk.f32.vlgmr.msra.gmra.mxu3 %vm142_vm4, %v135_v39 }
 0x10e   :  { %469 = vmatpush.msra.mxu2 %v1494_v19  ;;  %559 = vmatpush.msra.mxu3 %v1501_v21 }
 0x110   :  { %v132_v40 = vpop.f32.mrf.mxu1  ;;  %470 = vmatpush.msra.mxu2 %v1496_v20  ;;  %560 = vmatpush.msra.mxu3 %v1509_v23 }
 0x111   :  { %v133_v41 = vadd.f32 %v132_v40, %v39_v36 }
 0x112   :  { %471 = vmatpush.msra.mxu2 %v1505_v22  ;;  %561 = vmatpush.msra.mxu3 %v1517_v25 }
 0x113   :  { %v136_v42 = vmax.f32 %v133_v41, 0.0 }
 0x114   :  { %472 = vmatpush.msra.mxu2 %v1513_v24  ;;  %562 = vmatpush.msra.mxu3 %v1523_v27 }
 0x115   :  { %1279 = vmatmul.msk.f32.gmra.mxu2 %vm142_vm4, %v136_v42  ;;  %1281 = vmatmul.msk.f32.gmra.mxu3 %vm142_vm4, %v136_v42 }
 0x116   :  { %473 = vmatpush.msra.mxu2 %v1521_v26  ;;  %563 = vmatpush.msra.mxu3 %v1529_v29 }
 0x118   :  { %474 = vmatpush.msra.mxu2 %v1525_v28  ;;  %564 = vmatpush.msra.mxu3 %v1537_v31 }
 0x11a   :  { %475 = vmatpush.msra.mxu2 %v1533_v30  ;;  %565 = vmatpush.msra.mxu3 %v1545_v33 }
 0x11c   :  { %476 = vmatpush.msra.mxu2 %v1541_v32  ;;  %566 = vmatpush.msra.mxu3 %v1553_v34 }
 0x11d   :  { %1283 = vmatmul.msk.f32.vlgmr.msrb.gmra.mxu2 %vm212_vm3, %v1560_v35 }
 0x11e   :  { %689 = vmatpush.msrb.mxu2 %v1494_v19 }
 0x120   :  { %690 = vmatpush.msrb.mxu2 %v1496_v20 }
 0x122   :  { %691 = vmatpush.msrb.mxu2 %v1505_v22 }
 0x124   :  { %692 = vmatpush.msrb.mxu2 %v1513_v24 }
 0x126   :  { %693 = vmatpush.msrb.mxu2 %v1521_v26 }
 0x128   :  { %694 = vmatpush.msrb.mxu2 %v1525_v28 }
 0x12a   :  { %695 = vmatpush.msrb.mxu2 %v1533_v30 }
 0x12c   :  { %696 = vmatpush.msrb.mxu2 %v1541_v32 }
 0x190   :  { %v166_v46 = vpop.f32.mrf.mxu2  ;;  %v189_v47 = vpop.f32.mrf.mxu3 }
 0x191   :  { %v167_v48 = vadd.f32 %v166_v46, %v138_v44  ;;  %v190_v49 = vadd.f32 %v189_v47, %v139_v45 }
 0x193   :  { %v320_v50 = vrot.slane %v190_v49, 1  ;;  %v318_v51 = vrot.slane %v167_v48, 1  ;;  %v431_v52 = vrot.slane %v167_v48, 2  ;;  %v434_v53 = vrot.slane %v190_v49, 2 }
 0x194   :  { %v544_v56 = vrot.slane %v190_v49, 3  ;;  %v541_v57 = vrot.slane %v167_v48, 3  ;;  %v651_v58 = vrot.slane %v167_v48, 4  ;;  %v654_v59 = vrot.slane %v190_v49, 4 }
 0x195   :  { %v764_v62 = vrot.slane %v190_v49, 5  ;;  %v761_v63 = vrot.slane %v167_v48, 5  ;;  %v871_v0 = vrot.slane %v167_v48, 6  ;;  %v874_v1 = vrot.slane %v190_v49, 6 }
 0x196   :  { %v984_v2 = vrot.slane %v190_v49, 7  ;;  %v981_v3 = vrot.slane %v167_v48, 7 }
 0x198   :  { %v169_v54 = vpop.f32.mrf.mxu2  ;;  %v192_v55 = vpop.f32.mrf.mxu3 }
 0x199   :  { %v170_v60 = vadd.f32 %v169_v54, %v138_v44  ;;  %v193_v61 = vadd.f32 %v192_v55, %v139_v45 }
 0x19b   :  { %v205_v4 = vrot.slane %v170_v60, 7  ;;  %v208_v6 = vrot.slane %v193_v61, 7  ;;  %v1620_v7 = vsel %vm206_vm5, %v193_v61, %v320_v50  ;;  %v1623_v8 = vsel %vm206_vm5, %v170_v60, %v318_v51 }
 0x19c   :  { %v432_v9 = vrot.slane %v170_v60, 1  ;;  %v435_v10 = vrot.slane %v193_v61, 1  ;;  %v545_v11 = vrot.slane %v193_v61, 2  ;;  %v542_v12 = vrot.slane %v170_v60, 2 }
 0x19d   :  { %v1626_v13 = vsel %vm206_vm5, %v205_v4, %v167_v48  ;;  %v1629_v14 = vsel %vm206_vm5, %v208_v6, %v190_v49  ;;  %v652_v15 = vrot.slane %v170_v60, 3  ;;  %v655_v16 = vrot.slane %v193_v61, 3 }
 0x19e   :  { %v234_v17 = vadd.f32 %v233_v5, %v1626_v13  ;;  %v1633_v18 = vsel %vm206_vm5, %v432_v9, %v431_v52  ;;  %v1636_v36 = vsel %vm206_vm5, %v435_v10, %v434_v53  ;;  %v1639_v37 = vsel %vm206_vm5, %v545_v11, %v544_v56 }
 0x19f   :  { %v1642_v38 = vsel %vm206_vm5, %v542_v12, %v541_v57  ;;  %v1645_v39 = vsel %vm206_vm5, %v652_v15, %v651_v58  ;;  %v1648_v40 = vsel %vm206_vm5, %v655_v16, %v654_v59  ;;  %v765_v41 = vrot.slane %v193_v61, 4 }
 0x1a0   :  { %v1284_v42 = vmul.f32 -1.442695, %v234_v17  ;;  %v253_v43 = vpop.f32.mrf.mxu2  ;;  %v762_v44 = vrot.slane %v170_v60, 4  ;;  %v872_v45 = vrot.slane %v170_v60, 5  ;;  %v875_v46 = vrot.slane %v193_v61, 5 }
 0x1a1   :  { %v254_v47 = vadd.f32 %v253_v43, %v1629_v14  ;;  %v1652_v48 = vsel %vm206_vm5, %v765_v41, %v764_v62  ;;  %v985_v49 = vrot.slane %v193_v61, 6  ;;  %v982_v50 = vrot.slane %v170_v60, 6 }
 0x1a2   :  { %1337 = vpow2.f32 %v1284_v42  ;;  %v1655_v51 = vsel %vm206_vm5, %v762_v44, %v761_v63  ;;  %v1658_v52 = vsel %vm206_vm5, %v872_v45, %v871_v0  ;;  %v1661_v53 = vsel %vm206_vm5, %v875_v46, %v874_v1 }
 0x1a3   :  { %v1285_v54 = vmul.f32 -1.442695, %v254_v47  ;;  %v1664_v55 = vsel %vm206_vm5, %v985_v49, %v984_v2  ;;  %v1667_v56 = vsel %vm206_vm5, %v982_v50, %v981_v3 }
 0x1a5   :  { %1339 = vpow2.f32 %v1285_v54 }
 0x1a8   :  { %v1338_v57 = vpop.eup %1337 }
 0x1a9   :  { %v262_v58 = vadd.f32 1.0, %v1338_v57 }
 0x1ab   :  { %v1340_v59 = vpop.eup %1339  ;;  %1341 = vrcp.f32 %v262_v58  ;;  %v275_v11 = vand.u32 2147483648, %v262_v58  ;;  %vm269_vm10 = vweird.f32 %v262_v58  ;;  %v273_v15 = vand.u32 2147483647, %v262_v58 }
 0x1ac   :  { %v263_v60 = vadd.f32 1.0, %v1340_v59 }
 0x1ad   :  { %v276_v43 = vor.u32 1.1754944e-38, %v275_v11  ;;  %vm274_vm13 = vcmp.eq.f32.partialorder %v273_v15, 8.507059e+37 }
 0x1ae   :  { %1343 = vrcp.f32 %v263_v60  ;;  %v290_v6 = vand.u32 2147483648, %v263_v60  ;;  %v288_v9 = vand.u32 2147483647, %v263_v60  ;;  %vm284_vm8 = vweird.f32 %v263_v60 }
 0x1b0   :  { %v291_v12 = vor.u32 1.1754944e-38, %v290_v6  ;;  %vm289_vm11 = vcmp.eq.f32.partialorder %v288_v9, 8.507059e+37 }
 0x1b1   :  { %v1342_v61 = vpop.eup %1341 }
 0x1b2   :  { %v265_v62 = vmul.f32 %v1342_v61, %v262_v58  ;;  %vm270_vm7 = vweird.f32 %v1342_v61  ;;  %v196_v58 = vlaneseq }
 0x1b3   :  { %vm271_vm12 = vmor %vm269_vm10, %vm270_vm7 }
 0x1b4   :  { %v1344_v63 = vpop.eup %1343  ;;  %v266_v0 = vsub.f32 1.0, %v265_v62 }
 0x1b5   :  { %v280_v1 = vmul.f32 %v1344_v63, %v263_v60  ;;  %vm285_vm6 = vweird.f32 %v1344_v63  ;;  %v1676_v60 = vand.u32 127, %v196_v58 }
 0x1b6   :  { %v267_v4 = vmul.f32 %v1342_v61, %v266_v0  ;;  %vm286_vm9 = vmor %vm284_vm8, %vm285_vm6 }
 0x1b7   :  { %v281_v5 = vsub.f32 1.0, %v280_v1  ;;  %vm198_vm14 = vcmp.lt.s32.totalorder %v1676_v60, 32  ;;  %v66_v60 = vld [vmem:[#allocation2 + $0x170] ss:$0 sm:$0xff] }
 0x1b8   :  { %v268_v3 = vadd.f32 %v1342_v61, %v267_v4 }
 0x1b9   :  { %v282_v2 = vmul.f32 %v1344_v63, %v281_v5 }
 0x1ba   :  { %v272_v41 = vsel %vm271_vm12, %v1342_v61, %v268_v3 }
 0x1bb   :  { %v283_v10 = vadd.f32 %v1344_v63, %v282_v2  ;;  %v277_v45 = vsel %vm274_vm13, %v276_v43, %v272_v41 }
 0x1bc   :  { %v296_v47 = vmul.f32 %v277_v45, %v1560_v35 }
 0x1bd   :  { %v287_v16 = vsel %vm286_vm9, %v1344_v63, %v283_v10 }
 0x1be   :  { %v292_v17 = vsel %vm289_vm11, %v291_v12, %v287_v16 }
 0x1bf   :  { %v294_v42 = vmul.f32 2.0, %v292_v17 }
 0x1c1   :  { %v1286_v44 = vadd.f32 -1.0, %v294_v42 }
 0x1c3   :  { %v297_v46 = vmul.f32 %v1286_v44, %v277_v45 }
 0x1c5   :  { %299 = vrot.lane.b32.xlu0 %v297_v46, %s1456_s2 }
 0x237   :  { %v300_v49 = vpop.permute.xlu0 %299 }
 0x238   :  { %v302_v50 = vadd.f32 %v300_v49, %v296_v47 }
 0x23a   :  { %1345 = vtanh.f32 %v302_v50  ;;  %311 = vrot.lane.b32.xlu1 %v302_v50, %s1456_s2 }
 0x240   :  { %v1346_v54 = vpop.eup %1345 }
 0x241   :  { %v304_v57 = vmul.f32 %v1346_v54, %v292_v17 }
 0x242   :  { %314 = vrot.lane.b32.xlu1 %v1560_v35, %s1456_s2 }
 0x243   :  { %306 = vrot.lane.b32.xlu0 %v304_v57, %s1456_s2 }
 0x2ac   :  { %v312_v59 = vpop.permute.xlu1 %311 }
 0x2b4   :  { %v315_v61 = vpop.permute.xlu1 %314 }
 0x2b5   :  { %v307_v62 = vpop.permute.xlu0 %306  ;;  %v317_v63 = vsel %vm198_vm14, %v312_v59, %v315_v61 }
 0x2b6   :  { %v309_v0 = vsel %vm198_vm14, %v307_v62, %v1560_v35  ;;  %408 = vrot.lane.b32.xlu2 %v317_v63, %s1456_s2 }
 0x2b7   :  { %1287 = vmatmul.msk.f32.vlgmr.msrb.gmra.mxu3 %vm212_vm3, %v309_v0  ;;  %1288 = vmatmul.msk.f32.vlgmr.msrb.gmra.mxu1 %vm212_vm3, %v309_v0 }
 0x2b8   :  { %779 = vmatpush.msrb.mxu3 %v1501_v21  ;;  %799 = vmatpush.msrb.mxu1 %v1494_v19 }
 0x2ba   :  { %780 = vmatpush.msrb.mxu3 %v1509_v23  ;;  %800 = vmatpush.msrb.mxu1 %v1496_v20 }
 0x2bc   :  { %781 = vmatpush.msrb.mxu3 %v1517_v25  ;;  %801 = vmatpush.msrb.mxu1 %v1505_v22 }
 0x2be   :  { %782 = vmatpush.msrb.mxu3 %v1523_v27  ;;  %802 = vmatpush.msrb.mxu1 %v1513_v24 }
 0x2c0   :  { %783 = vmatpush.msrb.mxu3 %v1529_v29  ;;  %803 = vmatpush.msrb.mxu1 %v1521_v26 }
 0x2c2   :  { %784 = vmatpush.msrb.mxu3 %v1537_v31  ;;  %804 = vmatpush.msrb.mxu1 %v1525_v28 }
 0x2c4   :  { %785 = vmatpush.msrb.mxu3 %v1545_v33  ;;  %805 = vmatpush.msrb.mxu1 %v1533_v30 }
 0x2c6   :  { %786 = vmatpush.msrb.mxu3 %v1553_v34  ;;  %806 = vmatpush.msrb.mxu1 %v1541_v32 }
 0x334   :  { %v364_v35 = vpop.f32.mrf.mxu1 }
 0x335   :  { %v365_v1 = vadd.f32 %v364_v35, %v1620_v7 }
 0x337   :  { %v1290_v4 = vmul.f32 -1.442695, %v365_v1  ;;  %v409_v1 = vpop.permute.xlu2 %408 }
 0x339   :  { %1347 = vpow2.f32 %v1290_v4 }
 0x33a   :  { %v344_v5 = vpop.f32.mrf.mxu3 }
 0x33b   :  { %v345_v6 = vadd.f32 %v344_v5, %v1623_v8 }
 0x33d   :  { %v1289_v2 = vmul.f32 -1.442695, %v345_v6 }
 0x33f   :  { %v1348_v9 = vpop.eup %1347  ;;  %1349 = vpow2.f32 %v1289_v2 }
 0x340   :  { %v374_v3 = vadd.f32 1.0, %v1348_v9 }
 0x342   :  { %1351 = vrcp.f32 %v374_v3  ;;  %v401_v17 = vand.u32 2147483648, %v374_v3  ;;  %v399_v7 = vand.u32 2147483647, %v374_v3  ;;  %vm395_vm0 = vweird.f32 %v374_v3 }
 0x344   :  { %v402_v8 = vor.u32 1.1754944e-38, %v401_v17  ;;  %vm400_vm4 = vcmp.eq.f32.partialorder %v399_v7, 8.507059e+37 }
 0x345   :  { %v1350_v10 = vpop.eup %1349 }
 0x346   :  { %v373_v11 = vadd.f32 1.0, %v1350_v10 }
 0x348   :  { %v1352_v12 = vpop.eup %1351  ;;  %1353 = vrcp.f32 %v373_v11  ;;  %v386_v47 = vand.u32 2147483648, %v373_v11  ;;  %v384_v54 = vand.u32 2147483647, %v373_v11  ;;  %vm380_vm6 = vweird.f32 %v373_v11 }
 0x349   :  { %v391_v15 = vmul.f32 %v1352_v12, %v374_v3  ;;  %vm396_vm15 = vweird.f32 %v1352_v12  ;;  %v1712_v3 = vshrl.u32 %v196_v58, 7 }
 0x34a   :  { %vm397_vm1 = vmor %vm395_vm0, %vm396_vm15  ;;  %v387_v61 = vor.u32 1.1754944e-38, %v386_v47  ;;  %vm385_vm8 = vcmp.eq.f32.partialorder %v384_v54, 8.507059e+37 }
 0x34b   :  { %v392_v16 = vsub.f32 1.0, %v391_v15  ;;  %vm420_vm9 = vcmp.eq.s32.totalorder %v1712_v3, 0 }
 0x34d   :  { %v393_v41 = vmul.f32 %v1352_v12, %v392_v16 }
 0x34e   :  { %v1354_v42 = vpop.eup %1353 }
 0x34f   :  { %v376_v43 = vmul.f32 %v1354_v42, %v373_v11  ;;  %v394_v44 = vadd.f32 %v1352_v12, %v393_v41  ;;  %vm381_vm5 = vweird.f32 %v1354_v42 }
 0x350   :  { %vm382_vm7 = vmor %vm380_vm6, %vm381_vm5  ;;  %vm530_vm5 = vcmp.eq.s32.totalorder %v1712_v3, 1 }
 0x351   :  { %v377_v45 = vsub.f32 1.0, %v376_v43  ;;  %v398_v46 = vsel %vm397_vm1, %v1352_v12, %v394_v44 }
 0x352   :  { %v403_v49 = vsel %vm400_vm4, %v402_v8, %v398_v46 }
 0x353   :  { %v378_v50 = vmul.f32 %v1354_v42, %v377_v45  ;;  %v405_v57 = vmul.f32 2.0, %v403_v49 }
 0x355   :  { %v379_v59 = vadd.f32 %v1354_v42, %v378_v50  ;;  %v1291_v63 = vadd.f32 -1.0, %v405_v57 }
 0x357   :  { %v383_v62 = vsel %vm382_vm7, %v1354_v42, %v379_v59 }
 0x358   :  { %v388_v0 = vsel %vm385_vm8, %v387_v61, %v383_v62 }
 0x359   :  { %v412_v35 = vmul.f32 %v1291_v63, %v388_v0  ;;  %v411_v4 = vmul.f32 %v409_v1, %v388_v0 }
 0x35b   :  { %414 = vrot.lane.b32.xlu2 %v412_v35, %s1456_s2 }
 0x3b5   :  { %v415_v5 = vpop.permute.xlu2 %414 }
 0x3b6   :  { %v1706_v6 = vadd.f32 %v415_v5, %v411_v4 }
 0x3b8   :  { %1355 = vtanh.f32 %v1706_v6 }
 0x3be   :  { %v1356_v2 = vpop.eup %1355 }
 0x3bf   :  { %v1709_v9 = vmul.f32 %v1356_v2, %v403_v49 }
 0x3c1   :  { %429 = vrot.lane.b32.xlu0 %v1709_v9, %s1456_s2  ;;  %v422_v10 = vrot.slane %v1709_v9, 1 }
 0x3c3   :  { %v424_v11 = vperm.slane %v422_v10, 0 }
 0x3c5   :  { %v1720_v12 = vsel %vm420_vm9, %v424_v11, 0.0 }
 0x433   :  { %v430_v15 = vpop.permute.xlu0 %429 }
 0x434   :  { %1292 = vmatmul.msk.f32.vlgmr.msra.gmra.mxu0 %vm212_vm3, %v430_v15  ;;  %1293 = vmatmul.msk.f32.vlgmr.msra.gmra.mxu2 %vm212_vm3, %v430_v15 }
 0x435   :  { %889 = vmatpush.msra.mxu0 %v1501_v21  ;;  %909 = vmatpush.msra.mxu2 %v1494_v19 }
 0x437   :  { %890 = vmatpush.msra.mxu0 %v1509_v23  ;;  %910 = vmatpush.msra.mxu2 %v1496_v20 }
 0x439   :  { %891 = vmatpush.msra.mxu0 %v1517_v25  ;;  %911 = vmatpush.msra.mxu2 %v1505_v22 }
 0x43b   :  { %892 = vmatpush.msra.mxu0 %v1523_v27  ;;  %912 = vmatpush.msra.mxu2 %v1513_v24 }
 0x43d   :  { %893 = vmatpush.msra.mxu0 %v1529_v29  ;;  %913 = vmatpush.msra.mxu2 %v1521_v26 }
 0x43f   :  { %894 = vmatpush.msra.mxu0 %v1537_v31  ;;  %914 = vmatpush.msra.mxu2 %v1525_v28 }
 0x441   :  { %895 = vmatpush.msra.mxu0 %v1545_v33  ;;  %915 = vmatpush.msra.mxu2 %v1533_v30 }
 0x443   :  { %896 = vmatpush.msra.mxu0 %v1553_v34  ;;  %916 = vmatpush.msra.mxu2 %v1541_v32 }
 0x4b1   :  { %v458_v58 = vpop.f32.mrf.mxu0 }
 0x4b2   :  { %v459_v16 = vadd.f32 %v458_v58, %v1633_v18 }
 0x4b4   :  { %v1294_v17 = vmul.f32 -1.442695, %v459_v16 }
 0x4b6   :  { %1357 = vpow2.f32 %v1294_v17 }
 0x4b7   :  { %v478_v41 = vpop.f32.mrf.mxu2 }
 0x4b8   :  { %v479_v7 = vadd.f32 %v478_v41, %v1636_v36 }
 0x4ba   :  { %v1295_v42 = vmul.f32 -1.442695, %v479_v7 }
 0x4bc   :  { %v1358_v43 = vpop.eup %1357  ;;  %1359 = vpow2.f32 %v1295_v42 }
 0x4bd   :  { %v487_v44 = vadd.f32 1.0, %v1358_v43  ;;  %v423_v43 = vperm.slane %v1709_v9, 0 }
 0x4bf   :  { %1361 = vrcp.f32 %v487_v44  ;;  %v500_v0 = vand.u32 2147483648, %v487_v44  ;;  %vm494_vm15 = vweird.f32 %v487_v44  ;;  %v498_v1 = vand.u32 2147483647, %v487_v44 }
 0x4c1   :  { %v501_v11 = vor.u32 1.1754944e-38, %v500_v0  ;;  %vm499_vm4 = vcmp.eq.f32.partialorder %v498_v1, 8.507059e+37 }
 0x4c2   :  { %v1360_v8 = vpop.eup %1359 }
 0x4c3   :  { %v488_v45 = vadd.f32 1.0, %v1360_v8 }
 0x4c5   :  { %v1362_v46 = vpop.eup %1361  ;;  %1363 = vrcp.f32 %v488_v45  ;;  %v515_v59 = vand.u32 2147483648, %v488_v45  ;;  %v513_v62 = vand.u32 2147483647, %v488_v45  ;;  %vm509_vm12 = vweird.f32 %v488_v45 }
 0x4c6   :  { %v490_v47 = vmul.f32 %v1362_v46, %v487_v44  ;;  %vm495_vm11 = vweird.f32 %v1362_v46 }
 0x4c7   :  { %v516_v35 = vor.u32 1.1754944e-38, %v515_v59  ;;  %vm514_vm0 = vcmp.eq.f32.partialorder %v513_v62, 8.507059e+37  ;;  %vm496_vm1 = vmor %vm494_vm15, %vm495_vm11  ;;  %vm640_vm15 = vcmp.eq.s32.totalorder %v1712_v3, 2 }
 0x4c8   :  { %v491_v49 = vsub.f32 1.0, %v490_v47 }
 0x4ca   :  { %v492_v18 = vmul.f32 %v1362_v46, %v491_v49 }
 0x4cb   :  { %v1364_v50 = vpop.eup %1363 }
 0x4cc   :  { %v505_v54 = vmul.f32 %v1364_v50, %v488_v45  ;;  %vm510_vm10 = vweird.f32 %v1364_v50  ;;  %v493_v36 = vadd.f32 %v1362_v46, %v492_v18 }
 0x4cd   :  { %vm511_vm13 = vmor %vm509_vm12, %vm510_vm10 }
 0x4ce   :  { %v506_v57 = vsub.f32 1.0, %v505_v54  ;;  %v497_v2 = vsel %vm496_vm1, %v1362_v46, %v493_v36  ;;  %v427_v46 = vsel %vm420_vm9, %v423_v43, 0.0 }
 0x4cf   :  { %v502_v58 = vsel %vm499_vm4, %v501_v11, %v497_v2 }
 0x4d0   :  { %v507_v61 = vmul.f32 %v1364_v50, %v506_v57  ;;  %v521_v17 = vmul.f32 %v502_v58, %v1706_v6 }
 0x4d2   :  { %v508_v63 = vadd.f32 %v1364_v50, %v507_v61 }
 0x4d4   :  { %v512_v4 = vsel %vm511_vm13, %v1364_v50, %v508_v63 }
 0x4d5   :  { %v517_v5 = vsel %vm514_vm0, %v516_v35, %v512_v4 }
 0x4d6   :  { %v519_v10 = vmul.f32 2.0, %v517_v5 }
 0x4d8   :  { %v1296_v15 = vadd.f32 -1.0, %v519_v10 }
 0x4da   :  { %v522_v16 = vmul.f32 %v1296_v15, %v502_v58 }
 0x4dc   :  { %524 = vrot.lane.b32.xlu1 %v522_v16, %s1456_s2 }
 0x54e   :  { %v525_v41 = vpop.permute.xlu1 %524 }
 0x54f   :  { %v1744_v7 = vadd.f32 %v525_v41, %v521_v17 }
 0x551   :  { %1365 = vtanh.f32 %v1744_v7 }
 0x557   :  { %v1366_v42 = vpop.eup %1365 }
 0x558   :  { %v529_v44 = vmul.f32 %v1366_v42, %v517_v5 }
 0x55a   :  { %539 = vrot.lane.b32.xlu2 %v529_v44, %s1456_s2  ;;  %v532_v8 = vrot.slane %v529_v44, 1  ;;  %v533_v45 = vperm.slane %v529_v44, 0 }
 0x55c   :  { %v534_v47 = vperm.slane %v532_v8, 0  ;;  %v1752_v6 = vsel %vm530_vm5, %v533_v45, %v427_v46 }
 0x55e   :  { %v1755_v49 = vsel %vm530_vm5, %v534_v47, %v1720_v12 }
 0x5b4   :  { %v540_v50 = vpop.permute.xlu2 %539 }
 0x5b5   :  { %1297 = vmatmul.msk.f32.vlgmr.msra.gmra.mxu3 %vm212_vm3, %v540_v50  ;;  %1298 = vmatmul.msk.f32.vlgmr.msra.gmra.mxu1 %vm212_vm3, %v540_v50 }
 0x5b6   :  { %999 = vmatpush.msra.mxu3 %v1501_v21  ;;  %1019 = vmatpush.msra.mxu1 %v1494_v19 }
 0x5b8   :  { %1000 = vmatpush.msra.mxu3 %v1509_v23  ;;  %1020 = vmatpush.msra.mxu1 %v1496_v20 }
 0x5ba   :  { %1001 = vmatpush.msra.mxu3 %v1517_v25  ;;  %1021 = vmatpush.msra.mxu1 %v1505_v22 }
 0x5bc   :  { %1002 = vmatpush.msra.mxu3 %v1523_v27  ;;  %1022 = vmatpush.msra.mxu1 %v1513_v24 }
 0x5be   :  { %1003 = vmatpush.msra.mxu3 %v1529_v29  ;;  %1023 = vmatpush.msra.mxu1 %v1521_v26 }
 0x5c0   :  { %1004 = vmatpush.msra.mxu3 %v1537_v31  ;;  %1024 = vmatpush.msra.mxu1 %v1525_v28 }
 0x5c2   :  { %1005 = vmatpush.msra.mxu3 %v1545_v33  ;;  %1025 = vmatpush.msra.mxu1 %v1533_v30 }
 0x5c4   :  { %1006 = vmatpush.msra.mxu3 %v1553_v34  ;;  %1026 = vmatpush.msra.mxu1 %v1541_v32 }
 0x632   :  { %v588_v9 = vpop.f32.mrf.mxu1 }
 0x633   :  { %v589_v12 = vadd.f32 %v588_v9, %v1639_v37 }
 0x635   :  { %v1300_v54 = vmul.f32 -1.442695, %v589_v12 }
 0x637   :  { %1367 = vpow2.f32 %v1300_v54 }
 0x638   :  { %v568_v57 = vpop.f32.mrf.mxu3 }
 0x639   :  { %v569_v18 = vadd.f32 %v568_v57, %v1642_v38 }
 0x63b   :  { %v1299_v59 = vmul.f32 -1.442695, %v569_v18 }
 0x63d   :  { %v1368_v61 = vpop.eup %1367  ;;  %1369 = vpow2.f32 %v1299_v59 }
 0x63e   :  { %v598_v62 = vadd.f32 1.0, %v1368_v61 }
 0x640   :  { %1371 = vrcp.f32 %v598_v62  ;;  %v625_v4 = vand.u32 2147483648, %v598_v62  ;;  %v623_v37 = vand.u32 2147483647, %v598_v62  ;;  %vm619_vm7 = vweird.f32 %v598_v62 }
 0x642   :  { %v626_v38 = vor.u32 1.1754944e-38, %v625_v4  ;;  %vm624_vm9 = vcmp.eq.f32.partialorder %v623_v37, 8.507059e+37 }
 0x643   :  { %v1370_v36 = vpop.eup %1369 }
 0x644   :  { %v597_v63 = vadd.f32 1.0, %v1370_v36 }
 0x646   :  { %v1372_v0 = vpop.eup %1371  ;;  %1373 = vrcp.f32 %v597_v63  ;;  %v610_v16 = vand.u32 2147483648, %v597_v63  ;;  %v608_v42 = vand.u32 2147483647, %v597_v63  ;;  %vm604_vm11 = vweird.f32 %v597_v63 }
 0x647   :  { %v615_v35 = vmul.f32 %v1372_v0, %v598_v62  ;;  %vm620_vm6 = vweird.f32 %v1372_v0 }
 0x648   :  { %vm621_vm8 = vmor %vm619_vm7, %vm620_vm6  ;;  %v611_v8 = vor.u32 1.1754944e-38, %v610_v16  ;;  %vm609_vm13 = vcmp.eq.f32.partialorder %v608_v42, 8.507059e+37 }
 0x649   :  { %v616_v1 = vsub.f32 1.0, %v615_v35 }
 0x64b   :  { %v617_v5 = vmul.f32 %v1372_v0, %v616_v1 }
 0x64c   :  { %v1374_v2 = vpop.eup %1373 }
 0x64d   :  { %v600_v10 = vmul.f32 %v1374_v2, %v597_v63  ;;  %v618_v11 = vadd.f32 %v1372_v0, %v617_v5  ;;  %vm605_vm10 = vweird.f32 %v1374_v2 }
 0x64e   :  { %vm606_vm12 = vmor %vm604_vm11, %vm605_vm10  ;;  %vm750_vm10 = vcmp.eq.s32.totalorder %v1712_v3, 3 }
 0x64f   :  { %v601_v15 = vsub.f32 1.0, %v600_v10  ;;  %v622_v58 = vsel %vm621_vm8, %v1372_v0, %v618_v11 }
 0x650   :  { %v627_v17 = vsel %vm624_vm9, %v626_v38, %v622_v58 }
 0x651   :  { %v602_v41 = vmul.f32 %v1374_v2, %v601_v15  ;;  %v629_v43 = vmul.f32 2.0, %v627_v17 }
 0x653   :  { %v603_v44 = vadd.f32 %v1374_v2, %v602_v41  ;;  %v1301_v46 = vadd.f32 -1.0, %v629_v43 }
 0x655   :  { %v607_v45 = vsel %vm606_vm12, %v1374_v2, %v603_v44 }
 0x656   :  { %v612_v47 = vsel %vm609_vm13, %v611_v8, %v607_v45 }
 0x657   :  { %v632_v50 = vmul.f32 %v1301_v46, %v612_v47  ;;  %v631_v9 = vmul.f32 %v612_v47, %v1744_v7 }
 0x659   :  { %634 = vrot.lane.b32.xlu0 %v632_v50, %s1456_s2 }
 0x6cb   :  { %v635_v12 = vpop.permute.xlu0 %634 }
 0x6cc   :  { %v1779_v54 = vadd.f32 %v635_v12, %v631_v9 }
 0x6ce   :  { %1375 = vtanh.f32 %v1779_v54 }
 0x6d4   :  { %v1376_v57 = vpop.eup %1375 }
 0x6d5   :  { %v639_v18 = vmul.f32 %v1376_v57, %v627_v17 }
 0x6d7   :  { %649 = vrot.lane.b32.xlu1 %v639_v18, %s1456_s2  ;;  %v642_v59 = vrot.slane %v639_v18, 1  ;;  %v643_v61 = vperm.slane %v639_v18, 0 }
 0x6d9   :  { %v644_v62 = vperm.slane %v642_v59, 0  ;;  %v1785_v36 = vsel %vm640_vm15, %v643_v61, %v1752_v6 }
 0x6db   :  { %v1788_v63 = vsel %vm640_vm15, %v644_v62, %v1755_v49 }
 0x749   :  { %v650_v7 = vpop.permute.xlu1 %649 }
 0x74a   :  { %1302 = vmatmul.msk.f32.vlgmr.msrb.gmra.mxu0 %vm212_vm3, %v650_v7  ;;  %1303 = vmatmul.msk.f32.vlgmr.msrb.gmra.mxu2 %vm212_vm3, %v650_v7 }
 0x74b   :  { %1101 = vmatpush.msrb.mxu0 %v1501_v21  ;;  %1121 = vmatpush.msrb.mxu2 %v1494_v19 }
 0x74d   :  { %1102 = vmatpush.msrb.mxu0 %v1509_v23  ;;  %1122 = vmatpush.msrb.mxu2 %v1496_v20 }
 0x74f   :  { %1103 = vmatpush.msrb.mxu0 %v1517_v25  ;;  %1123 = vmatpush.msrb.mxu2 %v1505_v22 }
 0x751   :  { %1104 = vmatpush.msrb.mxu0 %v1523_v27  ;;  %1124 = vmatpush.msrb.mxu2 %v1513_v24 }
 0x753   :  { %1105 = vmatpush.msrb.mxu0 %v1529_v29  ;;  %1125 = vmatpush.msrb.mxu2 %v1521_v26 }
 0x755   :  { %1106 = vmatpush.msrb.mxu0 %v1537_v31  ;;  %1126 = vmatpush.msrb.mxu2 %v1525_v28 }
 0x757   :  { %1107 = vmatpush.msrb.mxu0 %v1545_v33  ;;  %1127 = vmatpush.msrb.mxu2 %v1533_v30 }
 0x759   :  { %1108 = vmatpush.msrb.mxu0 %v1553_v34  ;;  %1128 = vmatpush.msrb.mxu2 %v1541_v32 }
 0x7c7   :  { %v678_v19 = vpop.f32.mrf.mxu0 }
 0x7c8   :  { %v679_v20 = vadd.f32 %v678_v19, %v1645_v39 }
 0x7ca   :  { %v1304_v21 = vmul.f32 -1.442695, %v679_v20 }
 0x7cc   :  { %1377 = vpow2.f32 %v1304_v21 }
 0x7cd   :  { %v698_v22 = vpop.f32.mrf.mxu2 }
 0x7ce   :  { %v699_v23 = vadd.f32 %v698_v22, %v1648_v40 }
 0x7d0   :  { %v1305_v24 = vmul.f32 -1.442695, %v699_v23 }
 0x7d2   :  { %v1378_v25 = vpop.eup %1377  ;;  %1379 = vpow2.f32 %v1305_v24 }
 0x7d3   :  { %v707_v26 = vadd.f32 1.0, %v1378_v25 }
 0x7d5   :  { %1381 = vrcp.f32 %v707_v26  ;;  %v720_v1 = vand.u32 2147483648, %v707_v26  ;;  %vm714_vm6 = vweird.f32 %v707_v26  ;;  %v718_v5 = vand.u32 2147483647, %v707_v26 }
 0x7d7   :  { %v721_v38 = vor.u32 1.1754944e-38, %v720_v1  ;;  %vm719_vm9 = vcmp.eq.f32.partialorder %v718_v5, 8.507059e+37 }
 0x7d8   :  { %v1380_v27 = vpop.eup %1379 }
 0x7d9   :  { %v708_v28 = vadd.f32 1.0, %v1380_v27 }
 0x7db   :  { %v1382_v29 = vpop.eup %1381  ;;  %1383 = vrcp.f32 %v708_v28  ;;  %v735_v6 = vand.u32 2147483648, %v708_v28  ;;  %v733_v0 = vand.u32 2147483647, %v708_v28  ;;  %vm729_vm4 = vweird.f32 %v708_v28 }
 0x7dc   :  { %v710_v30 = vmul.f32 %v1382_v29, %v707_v26  ;;  %vm715_vm1 = vweird.f32 %v1382_v29 }
 0x7dd   :  { %v736_v4 = vor.u32 1.1754944e-38, %v735_v6  ;;  %vm734_vm7 = vcmp.eq.f32.partialorder %v733_v0, 8.507059e+37  ;;  %vm716_vm8 = vmor %vm714_vm6, %vm715_vm1  ;;  %vm860_vm6 = vcmp.eq.s32.totalorder %v1712_v3, 4 }
 0x7de   :  { %v711_v31 = vsub.f32 1.0, %v710_v30 }
 0x7e0   :  { %v712_v39 = vmul.f32 %v1382_v29, %v711_v31 }
 0x7e1   :  { %v1384_v32 = vpop.eup %1383 }
 0x7e2   :  { %v725_v33 = vmul.f32 %v1384_v32, %v708_v28  ;;  %vm730_vm0 = vweird.f32 %v1384_v32  ;;  %v713_v40 = vadd.f32 %v1382_v29, %v712_v39 }
 0x7e3   :  { %vm731_vm5 = vmor %vm729_vm4, %vm730_vm0 }
 0x7e4   :  { %v726_v34 = vsub.f32 1.0, %v725_v33  ;;  %v717_v10 = vsel %vm716_vm8, %v1382_v29, %v713_v40 }
 0x7e5   :  { %v722_v58 = vsel %vm719_vm9, %v721_v38, %v717_v10 }
 0x7e6   :  { %v727_v49 = vmul.f32 %v1384_v32, %v726_v34  ;;  %v741_v17 = vmul.f32 %v722_v58, %v1779_v54 }
 0x7e8   :  { %v728_v35 = vadd.f32 %v1384_v32, %v727_v49 }
 0x7ea   :  { %v732_v37 = vsel %vm731_vm5, %v1384_v32, %v728_v35 }
 0x7eb   :  { %v737_v2 = vsel %vm734_vm7, %v736_v4, %v732_v37 }
 0x7ec   :  { %v739_v11 = vmul.f32 2.0, %v737_v2 }
 0x7ee   :  { %v1306_v15 = vadd.f32 -1.0, %v739_v11 }
 0x7f0   :  { %v742_v16 = vmul.f32 %v1306_v15, %v722_v58 }
 0x7f2   :  { %744 = vrot.lane.b32.xlu2 %v742_v16, %s1456_s2 }
 0x84c   :  { %v745_v41 = vpop.permute.xlu2 %744 }
 0x84d   :  { %v747_v42 = vadd.f32 %v745_v41, %v741_v17 }
 0x84f   :  { %1385 = vtanh.f32 %v747_v42 }
 0x855   :  { %v1386_v43 = vpop.eup %1385 }
 0x856   :  { %v749_v44 = vmul.f32 %v1386_v43, %v737_v2 }
 0x858   :  { %759 = vrot.lane.b32.xlu0 %v749_v44, %s1456_s2  ;;  %v752_v8 = vrot.slane %v749_v44, 1  ;;  %v753_v45 = vperm.slane %v749_v44, 0 }
 0x85a   :  { %v754_v46 = vperm.slane %v752_v8, 0  ;;  %v1815_v47 = vsel %vm750_vm10, %v753_v45, %v1785_v36 }
 0x85c   :  { %v1818_v50 = vsel %vm750_vm10, %v754_v46, %v1788_v63 }
 0x8ca   :  { %v760_v9 = vpop.permute.xlu0 %759 }
 0x8cb   :  { %1307 = vmatmul.msk.f32.vlgmr.msrb.gmra.mxu3 %vm212_vm3, %v760_v9  ;;  %1308 = vmatmul.msk.f32.vlgmr.msrb.gmra.mxu1 %vm212_vm3, %v760_v9 }
 0x948   :  { %v808_v12 = vpop.f32.mrf.mxu1 }
 0x949   :  { %v809_v54 = vadd.f32 %v808_v12, %v1652_v48 }
 0x94b   :  { %v1310_v57 = vmul.f32 -1.442695, %v809_v54 }
 0x94d   :  { %1387 = vpow2.f32 %v1310_v57 }
 0x94e   :  { %v788_v18 = vpop.f32.mrf.mxu3 }
 0x94f   :  { %v789_v59 = vadd.f32 %v788_v18, %v1655_v51 }
 0x951   :  { %v1309_v61 = vmul.f32 -1.442695, %v789_v59 }
 0x953   :  { %v1388_v62 = vpop.eup %1387  ;;  %1389 = vpow2.f32 %v1309_v61 }
 0x954   :  { %v818_v36 = vadd.f32 1.0, %v1388_v62 }
 0x956   :  { %1391 = vrcp.f32 %v818_v36  ;;  %v845_v22 = vand.u32 2147483648, %v818_v36  ;;  %v843_v48 = vand.u32 2147483647, %v818_v36  ;;  %vm839_vm12 = vweird.f32 %v818_v36 }
 0x958   :  { %v846_v51 = vor.u32 1.1754944e-38, %v845_v22  ;;  %vm844_vm15 = vcmp.eq.f32.partialorder %v843_v48, 8.507059e+37 }
 0x959   :  { %v1390_v63 = vpop.eup %1389 }
 0x95a   :  { %v817_v7 = vadd.f32 1.0, %v1390_v63 }
 0x95c   :  { %v1392_v19 = vpop.eup %1391  ;;  %1393 = vrcp.f32 %v817_v7  ;;  %v830_v29 = vand.u32 2147483648, %v817_v7  ;;  %v828_v32 = vand.u32 2147483647, %v817_v7  ;;  %vm824_vm1 = vweird.f32 %v817_v7 }
 0x95d   :  { %v835_v20 = vmul.f32 %v1392_v19, %v818_v36  ;;  %vm840_vm11 = vweird.f32 %v1392_v19 }
 0x95e   :  { %vm841_vm13 = vmor %vm839_vm12, %vm840_vm11  ;;  %v831_v39 = vor.u32 1.1754944e-38, %v830_v29  ;;  %vm829_vm5 = vcmp.eq.f32.partialorder %v828_v32, 8.507059e+37 }
 0x95f   :  { %v836_v21 = vsub.f32 1.0, %v835_v20 }
 0x961   :  { %v837_v23 = vmul.f32 %v1392_v19, %v836_v21 }
 0x962   :  { %v1394_v24 = vpop.eup %1393 }
 0x963   :  { %v820_v25 = vmul.f32 %v1394_v24, %v817_v7  ;;  %v838_v26 = vadd.f32 %v1392_v19, %v837_v23  ;;  %vm825_vm0 = vweird.f32 %v1394_v24 }
 0x964   :  { %vm826_vm4 = vmor %vm824_vm1, %vm825_vm0  ;;  %vm970_vm0 = vcmp.eq.s32.totalorder %v1712_v3, 5 }
 0x965   :  { %v821_v27 = vsub.f32 1.0, %v820_v25  ;;  %v842_v28 = vsel %vm841_vm13, %v1392_v19, %v838_v26 }
 0x966   :  { %v847_v30 = vsel %vm844_vm15, %v846_v51, %v842_v28 }
 0x967   :  { %v822_v31 = vmul.f32 %v1394_v24, %v821_v27  ;;  %v849_v33 = vmul.f32 2.0, %v847_v30 }
 0x969   :  { %v823_v34 = vadd.f32 %v1394_v24, %v822_v31  ;;  %v1311_v49 = vadd.f32 -1.0, %v849_v33 }
 0x96b   :  { %v827_v6 = vsel %vm826_vm4, %v1394_v24, %v823_v34 }
 0x96c   :  { %v832_v0 = vsel %vm829_vm5, %v831_v39, %v827_v6 }
 0x96d   :  { %v852_v40 = vmul.f32 %v1311_v49, %v832_v0  ;;  %v851_v35 = vmul.f32 %v832_v0, %v747_v42 }
 0x96f   :  { %854 = vrot.lane.b32.xlu1 %v852_v40, %s1456_s2 }
 0x9e1   :  { %v855_v1 = vpop.permute.xlu1 %854 }
 0x9e2   :  { %v857_v4 = vadd.f32 %v855_v1, %v851_v35 }
 0x9e4   :  { %1395 = vtanh.f32 %v857_v4 }
 0x9ea   :  { %v1396_v5 = vpop.eup %1395 }
 0x9eb   :  { %v859_v37 = vmul.f32 %v1396_v5, %v847_v30 }
 0x9ed   :  { %869 = vrot.lane.b32.xlu2 %v859_v37, %s1456_s2  ;;  %v862_v2 = vrot.slane %v859_v37, 1  ;;  %v863_v10 = vperm.slane %v859_v37, 0 }
 0x9ef   :  { %v864_v11 = vperm.slane %v862_v2, 0  ;;  %v867_v38 = vsel %vm860_vm6, %v863_v10, %v1815_v47 }
 0x9f1   :  { %v1829_v15 = vsel %vm860_vm6, %v864_v11, %v1818_v50 }
 0xa47   :  { %v870_v58 = vpop.permute.xlu2 %869 }
 0xa48   :  { %1312 = vmatmul.msk.f32.vlgmr.msra.gmra.mxu0 %vm212_vm3, %v870_v58  ;;  %1313 = vmatmul.msk.f32.vlgmr.msra.gmra.mxu2 %vm212_vm3, %v870_v58 }
 0xac5   :  { %v898_v16 = vpop.f32.mrf.mxu0 }
 0xac6   :  { %v899_v17 = vadd.f32 %v898_v16, %v1658_v52 }
 0xac8   :  { %v1314_v41 = vmul.f32 -1.442695, %v899_v17 }
 0xaca   :  { %1397 = vpow2.f32 %v1314_v41 }
 0xacb   :  { %v918_v42 = vpop.f32.mrf.mxu2 }
 0xacc   :  { %v919_v43 = vadd.f32 %v918_v42, %v1661_v53 }
 0xace   :  { %v1315_v44 = vmul.f32 -1.442695, %v919_v43 }
 0xad0   :  { %v1398_v8 = vpop.eup %1397  ;;  %1399 = vpow2.f32 %v1315_v44 }
 0xad1   :  { %v927_v45 = vadd.f32 1.0, %v1398_v8 }
 0xad3   :  { %1401 = vrcp.f32 %v927_v45  ;;  %v940_v63 = vand.u32 2147483648, %v927_v45  ;;  %vm934_vm11 = vweird.f32 %v927_v45  ;;  %v938_v19 = vand.u32 2147483647, %v927_v45 }
 0xad5   :  { %v941_v48 = vor.u32 1.1754944e-38, %v940_v63  ;;  %vm939_vm15 = vcmp.eq.f32.partialorder %v938_v19, 8.507059e+37 }
 0xad6   :  { %v1400_v46 = vpop.eup %1399 }
 0xad7   :  { %v928_v47 = vadd.f32 1.0, %v1400_v46 }
 0xad9   :  { %v1402_v50 = vpop.eup %1401  ;;  %1403 = vrcp.f32 %v928_v47  ;;  %v955_v59 = vand.u32 2147483648, %v928_v47  ;;  %v953_v62 = vand.u32 2147483647, %v928_v47  ;;  %vm949_vm9 = vweird.f32 %v928_v47 }
 0xada   :  { %v930_v9 = vmul.f32 %v1402_v50, %v927_v45  ;;  %vm935_vm8 = vweird.f32 %v1402_v50 }
 0xadb   :  { %v956_v7 = vor.u32 1.1754944e-38, %v955_v59  ;;  %vm954_vm12 = vcmp.eq.f32.partialorder %v953_v62, 8.507059e+37  ;;  %vm936_vm13 = vmor %vm934_vm11, %vm935_vm8  ;;  %vm1080_vm11 = vcmp.eq.s32.totalorder %v1712_v3, 6 }
 0xadc   :  { %v931_v12 = vsub.f32 1.0, %v930_v9 }
 0xade   :  { %v932_v52 = vmul.f32 %v1402_v50, %v931_v12 }
 0xadf   :  { %v1404_v54 = vpop.eup %1403 }
 0xae0   :  { %v945_v57 = vmul.f32 %v1404_v54, %v928_v47  ;;  %vm950_vm7 = vweird.f32 %v1404_v54  ;;  %v933_v53 = vadd.f32 %v1402_v50, %v932_v52 }
 0xae1   :  { %vm951_vm10 = vmor %vm949_vm9, %vm950_vm7 }
 0xae2   :  { %v946_v18 = vsub.f32 1.0, %v945_v57  ;;  %v937_v22 = vsel %vm936_vm13, %v1402_v50, %v933_v53 }
 0xae3   :  { %v942_v25 = vsel %vm939_vm15, %v941_v48, %v937_v22 }
 0xae4   :  { %v947_v61 = vmul.f32 %v1404_v54, %v946_v18  ;;  %v961_v51 = vmul.f32 %v942_v25, %v857_v4 }
 0xae6   :  { %v948_v36 = vadd.f32 %v1404_v54, %v947_v61 }
 0xae8   :  { %v952_v20 = vsel %vm951_vm10, %v1404_v54, %v948_v36 }
 0xae9   :  { %v957_v21 = vsel %vm954_vm12, %v956_v7, %v952_v20 }
 0xaea   :  { %v959_v23 = vmul.f32 2.0, %v957_v21 }
 0xaec   :  { %v1316_v24 = vadd.f32 -1.0, %v959_v23 }
 0xaee   :  { %v962_v26 = vmul.f32 %v1316_v24, %v942_v25 }
 0xaf0   :  { %964 = vrot.lane.b32.xlu0 %v962_v26, %s1456_s2 }
 0xb62   :  { %v965_v27 = vpop.permute.xlu0 %964 }
 0xb63   :  { %v967_v28 = vadd.f32 %v965_v27, %v961_v51 }
 0xb65   :  { %1405 = vtanh.f32 %v967_v28 }
 0xb6b   :  { %v1406_v29 = vpop.eup %1405 }
 0xb6c   :  { %v969_v30 = vmul.f32 %v1406_v29, %v957_v21 }
 0xb6e   :  { %979 = vrot.lane.b32.xlu1 %v969_v30, %s1456_s2  ;;  %v972_v31 = vrot.slane %v969_v30, 1  ;;  %v973_v32 = vperm.slane %v969_v30, 0 }
 0xb70   :  { %v1838_v33 = vsel %vm970_vm0, %v973_v32, %v867_v38  ;;  %v974_v34 = vperm.slane %v972_v31, 0 }
 0xb72   :  { %v978_v39 = vsel %vm970_vm0, %v974_v34, %v1829_v15 }
 0xbe0   :  { %v980_v6 = vpop.permute.xlu1 %979 }
 0xbe1   :  { %1317 = vmatmul.msk.f32.vlgmr.msra.gmra.mxu3 %vm212_vm3, %v980_v6  ;;  %1318 = vmatmul.msk.f32.vlgmr.msra.gmra.mxu1 %vm212_vm3, %v980_v6 }
 0xc5e   :  { %v1028_v49 = vpop.f32.mrf.mxu1 }
 0xc5f   :  { %v1029_v0 = vadd.f32 %v1028_v49, %v1664_v55 }
 0xc61   :  { %v1320_v40 = vmul.f32 -1.442695, %v1029_v0 }
 0xc63   :  { %1407 = vpow2.f32 %v1320_v40 }
 0xc64   :  { %v1008_v35 = vpop.f32.mrf.mxu3 }
 0xc65   :  { %v1009_v1 = vadd.f32 %v1008_v35, %v1667_v56 }
 0xc67   :  { %v1319_v4 = vmul.f32 -1.442695, %v1009_v1 }
 0xc69   :  { %v1408_v5 = vpop.eup %1407  ;;  %1409 = vpow2.f32 %v1319_v4 }
 0xc6a   :  { %v1038_v37 = vadd.f32 1.0, %v1408_v5 }
 0xc6c   :  { %1411 = vrcp.f32 %v1038_v37  ;;  %v1065_v58 = vand.u32 2147483648, %v1038_v37  ;;  %v1063_v55 = vand.u32 2147483647, %v1038_v37  ;;  %vm1059_vm4 = vweird.f32 %v1038_v37 }
 0xc6e   :  { %v1066_v56 = vor.u32 1.1754944e-38, %v1065_v58  ;;  %vm1064_vm6 = vcmp.eq.f32.partialorder %v1063_v55, 8.507059e+37 }
 0xc6f   :  { %v1410_v2 = vpop.eup %1409 }
 0xc70   :  { %v1037_v10 = vadd.f32 1.0, %v1410_v2 }
 0xc72   :  { %v1412_v11 = vpop.eup %1411  ;;  %1413 = vrcp.f32 %v1037_v10  ;;  %v1050_v8 = vand.u32 2147483648, %v1037_v10  ;;  %v1048_v47 = vand.u32 2147483647, %v1037_v10  ;;  %vm1044_vm8 = vweird.f32 %v1037_v10 }
 0xc73   :  { %v1055_v38 = vmul.f32 %v1412_v11, %v1038_v37  ;;  %vm1060_vm1 = vweird.f32 %v1412_v11 }
 0xc74   :  { %vm1061_vm5 = vmor %vm1059_vm4, %vm1060_vm1  ;;  %v1051_v12 = vor.u32 1.1754944e-38, %v1050_v8  ;;  %vm1049_vm10 = vcmp.eq.f32.partialorder %v1048_v47, 8.507059e+37  ;;  %v63_v8 = vld [vmem:[#allocation2 + $0x140] sm:$0xff] }
 0xc75   :  { %v1056_v15 = vsub.f32 1.0, %v1055_v38 }
 0xc77   :  { %v1057_v16 = vmul.f32 %v1412_v11, %v1056_v15 }
 0xc78   :  { %v1414_v17 = vpop.eup %1413 }
 0xc79   :  { %v1040_v41 = vmul.f32 %v1414_v17, %v1037_v10  ;;  %v1058_v42 = vadd.f32 %v1412_v11, %v1057_v16  ;;  %vm1045_vm7 = vweird.f32 %v1414_v17 }
 0xc7a   :  { %vm1046_vm9 = vmor %vm1044_vm8, %vm1045_vm7  ;;  %vm1197_vm7 = vcmp.eq.s32.totalorder %v1712_v3, 7 }
 0xc7b   :  { %v1041_v43 = vsub.f32 1.0, %v1040_v41  ;;  %v1062_v44 = vsel %vm1061_vm5, %v1412_v11, %v1058_v42 }
 0xc7c   :  { %v1067_v45 = vsel %vm1064_vm6, %v1066_v56, %v1062_v44  ;;  %v64_v44 = vld [vmem:[#allocation2 + $0x150] sm:$0xff]  ;;  %vm1249_vm6 = vcmask 254976  }
 0xc7d   :  { %v1042_v46 = vmul.f32 %v1414_v17, %v1041_v43  ;;  %v1069_v50 = vmul.f32 2.0, %v1067_v45  ;;  %v65_v43 = vld [vmem:[#allocation2 + $0x160] sm:$0xff] }
 0xc7e   :  { %1236 = vmatpush.msrb.mxu3 %v65_v43 }
 0xc7f   :  { %v1043_v9 = vadd.f32 %v1414_v17, %v1042_v46  ;;  %v1321_v57 = vadd.f32 -1.0, %v1069_v50 }
 0xc80   :  { %1237 = vmatpush.msrb.mxu3 %v64_v44 }
 0xc81   :  { %v1047_v54 = vsel %vm1046_vm9, %v1414_v17, %v1043_v9 }
 0xc82   :  { %v1052_v18 = vsel %vm1049_vm10, %v1051_v12, %v1047_v54  ;;  %1238 = vmatpush.msrb.mxu3 %v63_v8 }
 0xc83   :  { %v1072_v52 = vmul.f32 %v1321_v57, %v1052_v18  ;;  %v1071_v59 = vmul.f32 %v1052_v18, %v967_v28 }
 0xc85   :  { %1074 = vrot.lane.b32.xlu2 %v1072_v52, %s1456_s2 }
 0xcdf   :  { %v1075_v61 = vpop.permute.xlu2 %1074 }
 0xce0   :  { %v1846_v62 = vadd.f32 %v1075_v61, %v1071_v59 }
 0xce2   :  { %1415 = vtanh.f32 %v1846_v62 }
 0xce8   :  { %v1416_v53 = vpop.eup %1415 }
 0xce9   :  { %v1079_v36 = vmul.f32 %v1416_v53, %v1067_v45  ;;  %v62_v45 = vld [vmem:[#allocation2 + $0x130] sm:$0xff] }
 0xcea   :  { %1239 = vmatpush.msrb.mxu3 %v62_v45 }
 0xceb   :  { %1089 = vrot.lane.b32.xlu0 %v1079_v36, %s1456_s2  ;;  %v1082_v63 = vrot.slane %v1079_v36, 1  ;;  %v1083_v19 = vperm.slane %v1079_v36, 0 }
 0xced   :  { %v1084_v7 = vperm.slane %v1082_v63, 0  ;;  %v1087_v21 = vsel %vm1080_vm11, %v1083_v19, %v1838_v33 }
 0xcef   :  { %v1088_v20 = vsel %vm1080_vm11, %v1084_v7, %v978_v39 }
 0xcf3   :  { %1206 = vrot.lane.b32.xlu0 %v1087_v21, %s1456_s2 }
 0xd5d   :  { %v1853_v22 = vpop.permute.xlu0 %1089 }
 0xd5e   :  { %1322 = vmatmul.msk.f32.vlgmr.msrb.gmra.mxu0 %vm212_vm3, %v1853_v22  ;;  %1323 = vmatmul.msk.f32.vlgmr.msrb.gmra.mxu2 %vm212_vm3, %v1853_v22 }
 0xd65   :  { %v1207_v12 = vpop.permute.xlu0 %1206 }
 0xddb   :  { %v1110_v23 = vpop.f32.mrf.mxu0 }
 0xddc   :  { %v1111_v48 = vadd.f32 %v1110_v23, %v1626_v13 }
 0xdde   :  { %v1324_v24 = vmul.f32 -1.442695, %v1111_v48 }
 0xde0   :  { %1417 = vpow2.f32 %v1324_v24 }
 0xde1   :  { %v1130_v25 = vpop.f32.mrf.mxu2 }
 0xde2   :  { %v1131_v26 = vadd.f32 %v1130_v25, %v1629_v14 }
 0xde4   :  { %v1325_v51 = vmul.f32 -1.442695, %v1131_v26 }
 0xde6   :  { %v1418_v27 = vpop.eup %1417  ;;  %1419 = vpow2.f32 %v1325_v51 }
 0xde7   :  { %v1139_v28 = vadd.f32 1.0, %v1418_v27 }
 0xde9   :  { %1421 = vrcp.f32 %v1139_v28  ;;  %v1152_v1 = vand.u32 2147483648, %v1139_v28  ;;  %vm1146_vm0 = vweird.f32 %v1139_v28  ;;  %v1150_v5 = vand.u32 2147483647, %v1139_v28 }
 0xdeb   :  { %v1153_v38 = vor.u32 1.1754944e-38, %v1152_v1  ;;  %vm1151_vm5 = vcmp.eq.f32.partialorder %v1150_v5, 8.507059e+37 }
 0xdec   :  { %v1420_v29 = vpop.eup %1419 }
 0xded   :  { %v1140_v30 = vadd.f32 1.0, %v1420_v29 }
 0xdef   :  { %v1422_v31 = vpop.eup %1421  ;;  %1423 = vrcp.f32 %v1140_v30  ;;  %v1167_v49 = vand.u32 2147483648, %v1140_v30  ;;  %v1165_v40 = vand.u32 2147483647, %v1140_v30  ;;  %vm1161_vm13 = vweird.f32 %v1140_v30 }
 0xdf0   :  { %v1142_v32 = vmul.f32 %v1422_v31, %v1139_v28  ;;  %vm1147_vm12 = vweird.f32 %v1422_v31 }
 0xdf1   :  { %v1168_v4 = vor.u32 1.1754944e-38, %v1167_v49  ;;  %vm1166_vm1 = vcmp.eq.f32.partialorder %v1165_v40, 8.507059e+37  ;;  %vm1148_vm4 = vmor %vm1146_vm0, %vm1147_vm12 }
 0xdf2   :  { %v1143_v33 = vsub.f32 1.0, %v1142_v32 }
 0xdf4   :  { %v1144_v13 = vmul.f32 %v1422_v31, %v1143_v33 }
 0xdf5   :  { %v1424_v34 = vpop.eup %1423 }
 0xdf6   :  { %v1157_v39 = vmul.f32 %v1424_v34, %v1140_v30  ;;  %vm1162_vm3 = vweird.f32 %v1424_v34  ;;  %v1145_v14 = vadd.f32 %v1422_v31, %v1144_v13 }
 0xdf7   :  { %vm1163_vm15 = vmor %vm1161_vm13, %vm1162_vm3 }
 0xdf8   :  { %v1158_v6 = vsub.f32 1.0, %v1157_v39  ;;  %v1149_v10 = vsel %vm1148_vm4, %v1422_v31, %v1145_v14 }
 0xdf9   :  { %v1154_v58 = vsel %vm1151_vm5, %v1153_v38, %v1149_v10 }
 0xdfa   :  { %v1159_v0 = vmul.f32 %v1424_v34, %v1158_v6  ;;  %v1173_v55 = vmul.f32 %v1154_v58, %v1846_v62 }
 0xdfc   :  { %v1160_v35 = vadd.f32 %v1424_v34, %v1159_v0 }
 0xdfe   :  { %v1164_v37 = vsel %vm1163_vm15, %v1424_v34, %v1160_v35 }
 0xdff   :  { %v1169_v2 = vsel %vm1166_vm1, %v1168_v4, %v1164_v37 }
 0xe00   :  { %v1171_v11 = vmul.f32 2.0, %v1169_v2 }
 0xe02   :  { %v1326_v15 = vadd.f32 -1.0, %v1171_v11 }
 0xe04   :  { %v1174_v16 = vmul.f32 %v1326_v15, %v1154_v58 }
 0xe06   :  { %1176 = vrot.lane.b32.xlu1 %v1174_v16, %s1456_s2 }
 0xe0e   :  { %1208 = vrot.lane.b32.xlu1 %v1088_v20, %s1456_s2 }
 0xe16   :  { %1189 = vrot.lane.b32.xlu1 %v1846_v62, %s1456_s2 }
 0xe78   :  { %v1177_v17 = vpop.permute.xlu1 %1176 }
 0xe79   :  { %v1179_v41 = vadd.f32 %v1177_v17, %v1173_v55 }
 0xe7b   :  { %1425 = vtanh.f32 %v1179_v41 }
 0xe80   :  { %v1209_v18 = vpop.permute.xlu1 %1208 }
 0xe81   :  { %v1426_v42 = vpop.eup %1425 }
 0xe82   :  { %v1181_v56 = vmul.f32 %v1426_v42, %v1169_v2 }
 0xe84   :  { %1184 = vrot.lane.b32.xlu2 %v1181_v56, %s1456_s2 }
 0xe88   :  { %v1190_v3 = vpop.permute.xlu1 %1189 }
 0xede   :  { %v1185_v46 = vpop.permute.xlu2 %1184 }
 0xedf   :  { %v1187_v47 = vsel %vm198_vm14, %v1853_v22, %v1185_v46 }
 0xee0   :  { %v1199_v50 = vrot.slane %v1187_v47, 1  ;;  %v1200_v9 = vperm.slane %v1187_v47, 0  ;;  %1250 = vst.msk [vmem:[%s1902_s4] sm:$0x3] %vm1249_vm6, %v1187_v47 }
 0xee2   :  { %v1212_v54 = vsel %vm1197_vm7, %v1200_v9, %v1207_v12  ;;  %v1201_v57 = vperm.slane %v1199_v50, 0 }
 0xee3   :  { %1216 = vrot.lane.b32.xlu2 %v1212_v54, %s1457_s28 }
 0xee4   :  { %v1213_v52 = vsel %vm1197_vm7, %v1201_v57, %v1209_v18 }
 0xee5   :  { %1218 = vrot.lane.b32.xlu0 %v1213_v52, %s1457_s28 }
 0xeeb   :  { %1193 = vrot.lane.b32.xlu2 %v1179_v41, %s1456_s2 }
 0xeed   :  { %1251 = vrot.lane.b32.xlu0 %v1187_v47, %s1457_s28 }
 0xf3d   :  { %v1217_v59 = vpop.permute.xlu2 %1216 }
 0xf3e   :  { %1327 = vmatmul.msk.f32.vlgmr.msrb.gmra.mxu3 %vm105_vm2, %v1217_v59 }
 0xf45   :  { %v1194_v61 = vpop.permute.xlu2 %1193 }
 0xf46   :  { %v1196_v62 = vsel %vm198_vm14, %v1190_v3, %v1194_v61 }
 0xf47   :  { %1259 = vrot.lane.b32.xlu1 %v1196_v62, %s1457_s28  ;;  %1330 = vst.msk [vmem:[%s1902_s4 + $0x4] sm:$0x3] %vm1249_vm6, %v1196_v62 }
 0xf57   :  { %v1219_v53 = vpop.permute.xlu0 %1218 }
 0xf58   :  { %1328 = vmatmul.msk.f32.gmra.mxu3 %vm105_vm2, %v1219_v53 }
 0xf5f   :  { %v1252_v36 = vpop.permute.xlu0 %1251 }
 0xf60   :  { %1329 = vst.msk [vmem:[%s1902_s4 + $0x2] sm:$0x3] %vm1249_vm6, %v1252_v36 }
 0xfb9   :  { %v1260_v63 = vpop.permute.xlu1 %1259 }
 0xfba   :  { %1331 = vst.msk [vmem:[%s1902_s4 + $0x6] sm:$0x3] %vm1249_vm6, %v1260_v63 }
 0xfc1   :  { %v1241_v7 = vpop.f32.mrf.mxu3 }
 0xfc2   :  { %v1242_v19 = vadd.f32 %v1241_v7, %v66_v60 }
 0xfc4   :  { %1247 = vst [vmem:[%s1901_s3] sm:$0xff] %v1242_v19 }
 0xfdb   :  { %v1244_v20 = vpop.f32.mrf.mxu3 }
 0xfdc   :  { %v1245_v21 = vadd.f32 %v1244_v20, %v66_v60 }
 0xfde   :  { %1248 = vst [vmem:[%s1901_s3 + $0x8] sm:$0xff] %v1245_v21 }
 0xfdf   :  { %1272 = vsyncpa [#allocation3], 1 }

</bundles_post_ra>
